<compile_context>
chip_gen: v5e
topology: v5e:2x2
jax: 0.10.0
libtpu: 0.0.40
codegen_flags: <defaults>
</compile_context>

<pallas_src>
import jax
import jax.numpy as jnp
from jax.experimental import pallas as pl
from jax.experimental.pallas import tpu as pltpu


def self_attention_kernel(x_ref, wqkv_ref, bqkv_ref, o_ref):
    Bt, S, D = x_ref.shape
    x = x_ref[...]                                   # (Bt, S, D) f32
    x2d = x.reshape(Bt * S, D)                       # merge leading dims (layout-free)

    # Fused QKV projection: one MXU pass with N = 3D.  Weights are bf16,
    # accumulation is f32; the 1/sqrt(64) scale is already folded into the
    # Q columns / bias by the wrapper.
    qkv = jnp.dot(x2d.astype(jnp.bfloat16), wqkv_ref[...],
                  preferred_element_type=jnp.float32) + bqkv_ref[...]   # (Bt*S, 3D)

    # Lane-aligned static slices (D is a multiple of 128).
    q = qkv[:, 0 * D:1 * D].reshape(Bt, S, D)
    k = qkv[:, 1 * D:2 * D].reshape(Bt, S, D)
    v = qkv[:, 2 * D:3 * D].reshape(Bt, S, D)

    # Scores: batched contraction over the feature dim (no explicit k.T).
    s = jnp.einsum("bqd,bkd->bqk",
                   q.astype(jnp.bfloat16), k.astype(jnp.bfloat16),
                   preferred_element_type=jnp.float32)          # (Bt, S, S)

    # Numerically-stable softmax in f32; reciprocal on the EUP.
    m = jnp.max(s, axis=-1, keepdims=True)
    e = jnp.exp(s - m)
    denom = jnp.sum(e, axis=-1, keepdims=True)
    attn = e * pl.reciprocal(denom, approx=True)

    # TODO(synk): nn.Dropout(0.5) on the attention weights is identity in eval
    # mode; training-mode dropout would need pltpu.prng_seed/prng_random_bits
    # driven by a seed input.

    out = jnp.einsum("bqk,bkd->bqd",
                     attn.astype(jnp.bfloat16), v.astype(jnp.bfloat16),
                     preferred_element_type=jnp.float32)        # (Bt, S, D)
    o_ref[...] = (out + x).astype(o_ref.dtype)


def _pick_batch_tile(B, S, target_rows=256):
    """Smallest divisor of B such that Bt*S >= target_rows (else B)."""
    bt = 1
    for cand in range(1, B + 1):
        if B % cand == 0:
            bt = cand
            if cand * S >= target_rows:
                break
    return bt


def self_attention(x, wq, bq, wk, bk, wv, bv):
    """x: (B, S, D) float32.  w*: (out, in) PyTorch-style; b*: (out,)."""
    B, S, D = x.shape
    scale = 1.0 / (64.0 ** 0.5)   # the PyTorch module always divides by sqrt(64)

    # Fold the scale into the Q projection, fuse Q/K/V into one (D, 3D) weight
    # (pre-transposed to (in, out)), pre-cast weights to bf16 once.
    wqkv = jnp.concatenate([wq.T * scale, wk.T, wv.T], axis=1).astype(jnp.bfloat16)
    bqkv = jnp.concatenate([bq * scale, bk, bv]).reshape(1, 3 * D).astype(jnp.float32)

    Bt = _pick_batch_tile(B, S)

    return pl.pallas_call(
        self_attention_kernel,
        out_shape=jax.ShapeDtypeStruct((B, S, D), x.dtype),
        grid_spec=pltpu.PrefetchScalarGridSpec(
            num_scalar_prefetch=0,
            grid=(B // Bt,),
            in_specs=[
                pl.BlockSpec((Bt, S, D), lambda b: (b, 0, 0)),     # x
                pl.BlockSpec((D, 3 * D), lambda b: (0, 0)),        # fused W_qkv (resident)
                pl.BlockSpec((1, 3 * D), lambda b: (0, 0)),        # fused b_qkv (resident)
            ],
            out_specs=pl.BlockSpec((Bt, S, D), lambda b: (b, 0, 0)),
        ),
        compiler_params=pltpu.CompilerParams(
            dimension_semantics=("parallel",)),
    )(x, wqkv, bqkv)


def reference(x, wq, bq, wk, bk, wv, bv):
    q = x @ wq.T + bq
    k = x @ wk.T + bk
    v = x @ wv.T + bv
    s = jnp.einsum("bqd,bkd->bqk", q, k) / (64.0 ** 0.5)
    attn = jax.nn.softmax(s, axis=-1)
    return jnp.einsum("bqk,bkd->bqd", attn, v) + x


if __name__ == "__main__":
    # input_dim == output_dim so the residual add is valid; D = 128 keeps the
    # kernel lane-dense and Bt*S fills the MXU.
    B, S, D = 4, 128, 128
    key = jax.random.PRNGKey(0)
    kx, kq, kk, kv, kbq, kbk, kbv = jax.random.split(key, 7)

    x = jax.random.normal(kx, (B, S, D), dtype=jnp.float32)
    # Deterministic parameter init (PyTorch Linear shapes: W (out,in), b (out,)).
    bound = 1.0 / (D ** 0.5)
    wq = jax.random.uniform(kq, (D, D), jnp.float32, -bound, bound)
    wk = jax.random.uniform(kk, (D, D), jnp.float32, -bound, bound)
    wv = jax.random.uniform(kv, (D, D), jnp.float32, -bound, bound)
    bq = jax.random.uniform(kbq, (D,), jnp.float32, -bound, bound)
    bk = jax.random.uniform(kbk, (D,), jnp.float32, -bound, bound)
    bv = jax.random.uniform(kbv, (D,), jnp.float32, -bound, bound)

    out = self_attention(x, wq, bq, wk, bk, wv, bv)
    jax.block_until_ready(out)

    ref = reference(x, wq, bq, wk, bk, wv, bv)
    assert out.shape == (B, S, D)
    # bf16 matmul inputs (f32 accumulation) -> relaxed tolerance vs f32 reference.
    assert jnp.allclose(out, ref, atol=5e-2, rtol=5e-2), "mismatch vs reference"
    print("KERNEL_OK")
</pallas_src>

<mosaic_0001>
module attributes {stable_mosaic.version = 11 : i64} {
  func.func @self_attention_kernel(%arg0: i32, %arg1: memref<2x128x128xf32, #tpu.memory_space<vmem>>, %arg2: memref<128x384xbf16, #tpu.memory_space<vmem>>, %arg3: memref<1x384xf32, #tpu.memory_space<vmem>>, %arg4: memref<2x128x128xf32, #tpu.memory_space<vmem>>) attributes {dimension_semantics = [#tpu.dimension_semantics<parallel>], iteration_bounds = array<i64: 2>, scalar_prefetch = 0 : i64, scratch_operands = 0 : i64, tpu.core_type = #tpu.core_type<tc>, window_params = [{transform_indices = @transform_0, window_bounds = array<i64: 2, 128, 128>}, {pipeline_mode = #tpu.pipeline_mode<synchronous>, transform_indices = @transform_1, window_bounds = array<i64: 128, 384>}, {pipeline_mode = #tpu.pipeline_mode<synchronous>, transform_indices = @transform_2, window_bounds = array<i64: 1, 384>}, {transform_indices = @transform_3, window_bounds = array<i64: 2, 128, 128>}]} {
    %c0 = arith.constant 0 : index
    %c0_0 = arith.constant 0 : index
    %c0_1 = arith.constant 0 : index
    %0 = vector.load %arg1[%c0, %c0_0, %c0_1] : memref<2x128x128xf32, #tpu.memory_space<vmem>>, vector<2x128x128xf32>
    %1 = vector.shape_cast %0 : vector<2x128x128xf32> to vector<256x128xf32>
    %2 = arith.truncf %1 : vector<256x128xf32> to vector<256x128xbf16>
    %c0_2 = arith.constant 0 : index
    %c0_3 = arith.constant 0 : index
    %3 = vector.load %arg2[%c0_2, %c0_3] : memref<128x384xbf16, #tpu.memory_space<vmem>>, vector<128x384xbf16>
    %cst = arith.constant dense<0.000000e+00> : vector<256x384xf32>
    %4 = tpu.matmul %2, %3, %cst {dimension_numbers = #tpu.dot_dimension_numbers<[1], [0], [0], [1], [0, 0, 1, 1], [], []>} : vector<256x128xbf16>, vector<128x384xbf16>, vector<256x384xf32> -> vector<256x384xf32>
    %c0_4 = arith.constant 0 : index
    %c0_5 = arith.constant 0 : index
    %5 = vector.load %arg3[%c0_4, %c0_5] : memref<1x384xf32, #tpu.memory_space<vmem>>, vector<1x384xf32>
    %6 = vector.broadcast %5 : vector<1x384xf32> to vector<256x384xf32>
    %7 = arith.addf %4, %6 : vector<256x384xf32>
    %8 = vector.extract_strided_slice %7 {offsets = [0, 0], sizes = [256, 128], strides = [1, 1]} : vector<256x384xf32> to vector<256x128xf32>
    %9 = vector.shape_cast %8 : vector<256x128xf32> to vector<2x128x128xf32>
    %10 = vector.extract_strided_slice %7 {offsets = [0, 128], sizes = [256, 128], strides = [1, 1]} : vector<256x384xf32> to vector<256x128xf32>
    %11 = vector.shape_cast %10 : vector<256x128xf32> to vector<2x128x128xf32>
    %12 = vector.extract_strided_slice %7 {offsets = [0, 256], sizes = [256, 128], strides = [1, 1]} : vector<256x384xf32> to vector<256x128xf32>
    %13 = vector.shape_cast %12 : vector<256x128xf32> to vector<2x128x128xf32>
    %14 = arith.truncf %9 : vector<2x128x128xf32> to vector<2x128x128xbf16>
    %15 = arith.truncf %11 : vector<2x128x128xf32> to vector<2x128x128xbf16>
    "tpu.trace_start"() <{level = 10 : i32, message = "bqd,bkd->bqk"}> : () -> ()
    %cst_6 = arith.constant dense<0.000000e+00> : vector<2x128x128xf32>
    %16 = tpu.matmul %14, %15, %cst_6 {dimension_numbers = #tpu.dot_dimension_numbers<[2], [2], [1], [1], [0, 0, 0, 1, 1, 1], [0], [0]>} : vector<2x128x128xbf16>, vector<2x128x128xbf16>, vector<2x128x128xf32> -> vector<2x128x128xf32>
    "tpu.trace_stop"() : () -> ()
    %cst_7 = arith.constant dense<0xFF800000> : vector<2x128xf32>
    %17 = vector.multi_reduction <maximumf>, %16, %cst_7 [2] : vector<2x128x128xf32> to vector<2x128xf32>
    %18 = vector.shape_cast %17 : vector<2x128xf32> to vector<2x128x1xf32>
    %19 = vector.broadcast %18 : vector<2x128x1xf32> to vector<2x128x128xf32>
    %20 = arith.subf %16, %19 : vector<2x128x128xf32>
    %21 = math.exp %20 : vector<2x128x128xf32>
    %cst_8 = arith.constant dense<0.000000e+00> : vector<2x128xf32>
    %22 = vector.multi_reduction <add>, %21, %cst_8 [2] : vector<2x128x128xf32> to vector<2x128xf32>
    %23 = vector.shape_cast %22 : vector<2x128xf32> to vector<2x128x1xf32>
    %24 = tpu.reciprocal %23 {approx = true} : vector<2x128x1xf32> -> vector<2x128x1xf32>
    %25 = vector.broadcast %24 : vector<2x128x1xf32> to vector<2x128x128xf32>
    %26 = arith.mulf %21, %25 : vector<2x128x128xf32>
    %27 = arith.truncf %26 : vector<2x128x128xf32> to vector<2x128x128xbf16>
    %28 = arith.truncf %13 : vector<2x128x128xf32> to vector<2x128x128xbf16>
    "tpu.trace_start"() <{level = 10 : i32, message = "bqk,bkd->bqd"}> : () -> ()
    %cst_9 = arith.constant dense<0.000000e+00> : vector<2x128x128xf32>
    %29 = tpu.matmul %27, %28, %cst_9 {dimension_numbers = #tpu.dot_dimension_numbers<[2], [1], [1], [2], [0, 0, 0, 1, 1, 2], [0], [0]>} : vector<2x128x128xbf16>, vector<2x128x128xbf16>, vector<2x128x128xf32> -> vector<2x128x128xf32>
    "tpu.trace_stop"() : () -> ()
    %30 = arith.addf %29, %0 : vector<2x128x128xf32>
    %c0_10 = arith.constant 0 : index
    %c0_11 = arith.constant 0 : index
    %c0_12 = arith.constant 0 : index
    %31 = vector.load %arg4[%c0_10, %c0_11, %c0_12] : memref<2x128x128xf32, #tpu.memory_space<vmem>>, vector<2x128x128xf32>
    tpu.vector_store %arg4[%c0_10, %c0_11, %c0_12], %30 {strides = array<i32>} : memref<2x128x128xf32, #tpu.memory_space<vmem>>, vector<2x128x128xf32>,
    return
  }
  func.func @transform_0(%arg0: i32) -> (i32, i32, i32) {
    %c0_i32 = arith.constant 0 : i32
    %c0_i32_0 = arith.constant 0 : i32
    %c0_i32_1 = arith.constant 0 : i32
    return %arg0, %c0_i32, %c0_i32_0 : i32, i32, i32
  }
  func.func @transform_1(%arg0: i32) -> (i32, i32) {
    %c0_i32 = arith.constant 0 : i32
    %c0_i32_0 = arith.constant 0 : i32
    %c0_i32_1 = arith.constant 0 : i32
    return %c0_i32, %c0_i32_0 : i32, i32
  }
  func.func @transform_2(%arg0: i32) -> (i32, i32) {
    %c0_i32 = arith.constant 0 : i32
    %c0_i32_0 = arith.constant 0 : i32
    %c0_i32_1 = arith.constant 0 : i32
    return %c0_i32, %c0_i32_0 : i32, i32
  }
  func.func @transform_3(%arg0: i32) -> (i32, i32, i32) {
    %c0_i32 = arith.constant 0 : i32
    %c0_i32_0 = arith.constant 0 : i32
    %c0_i32_1 = arith.constant 0 : i32
    return %arg0, %c0_i32, %c0_i32_0 : i32, i32, i32
  }
}

</mosaic_0001>

<bundles_post_ra>
// kernel: tpu_custom_call.1
= control target key start
LH: loop header
LB: loop body
LE: loop exit
PB: predicated region body
PF: predicated region fallthrough
CT: control target
= control target key end

     0   :  { %8 = vsyncpa [#allocation3], 0  ;;  %s3268_s0 = inlined_call_operand.hbm [shape: f32[4,128,128], index: 0, kind: input, shape index: {}]   ;;  %s3269_s1 = inlined_call_operand.hbm [shape: bf16[128,384], index: 1, kind: input, shape index: {}]   ;;  %s3270_s2 = inlined_call_operand.hbm [shape: f32[1,384], index: 2, kind: input, shape index: {}]   ;;  %s3271_s3 = inlined_call_operand.hbm [shape: f32[4,128,128], index: 3, kind: output, shape index: {}]  }
   0x1   :  { %10 = vsyncpa [#allocation3 + $0x1], 0 }
   0x2   :  { %11 = vsyncpa [#allocation6], 0 }
   0x3   :  { %12 = vsyncpa [#allocation4], 0 }
   0x4   :  { %14 = vsyncpa [#allocation4 + $0x1], 0  ;;  %s2436_s12 = smov 0   ;;  %s2438_s13 = smov 0  }
   0x5   :  { %s2440_s14 = smov 0   ;;  %s2442_s15 = smov 0  }
   0x6 LB: > { %s2457_s16 = sadd.s32 4294967295, %s2406_s15   ;;  %s1845_s17 = sadd.s32 4294967294, %s2406_s15   ;;  %s2406_s15 = sphi %s2442_s15, %s3281_s15   ;;  %s2402_s14 = sphi %s2440_s14, %s3280_s14   ;;  %s2398_s13 = sphi %s2438_s13, %s3279_s13   ;;  %s2394_s12 = sphi %s2436_s12, %s3278_s12  }
   0x7   : > { %p40_p0 = scmp.ne.s32.totalorder %s2398_s13, %s2394_s12  ;;  %p41_p1 = scmp.eq.s32.totalorder %s2457_s16, 0 }
   0x8   : > { %p106_p2 = scmp.eq.s32.totalorder %s2457_s16, 1  ;;  %p112_p3 = scmp.eq.s32.totalorder %s1845_s17, 1 }
   0x9   : > { %p2466_p4 = por %p41_p1, %p40_p0  ;;  %p1846_p5 = scmp.ge.s32.totalorder %s2406_s15, 1 }
   0xa   : > { %p2471_p6 = por %p112_p3, %p40_p0  ;;  %p119_p7 = scmp.lt.s32.totalorder %s2406_s15, 3 }
   0xb   : > { %s130_s22 = sshll.u32 %s3269_s1, 4  ;;  %s2408_s24 = smov [#allocation5]   ;;  %s131_s22 = int_to_ptr.hbm [resolvable:$true] %s130_s22 }
   0xc   : > { %p2479_p8 = pnand %p1846_p5, %p119_p7  ;;  %s132_s25 = sshll.u32 %s2408_s24, 4  ;;  %s133_s25 = int_to_ptr.vmem [resolvable:$true] %s132_s25 }
   0xd   : > { %s145_s28 = sshll.u32 %s3270_s2, 4  ;;  %s2409_s29 = smov 192   ;;  %s146_s28 = int_to_ptr.hbm [resolvable:$true] %s145_s28 }
   0xe   : > { %p2025_p9 = pneg %p2479_p8  ;;  %s2410_s30 = smov 12  }
   0xf   : > { %s2411_s4 = smov [#allocation7]   ;;  %s2492_s6 = sadd.s32 1, %s2406_s15  }
  0x10   : > { %p2026_p10 = pnand %p2025_p9, %p41_p1  ;;  %s147_s5 = sshll.u32 %s2411_s4, 4  ;;  %s148_s5 = int_to_ptr.vmem [resolvable:$true] %s147_s5 }
  0x11   : > { %s27_s7 = sadd.s32 1, %s2402_s14  ;;  %s24_s8 = ssub.s32 %s2406_s15, %s2492_s6 }
  0x12   : > { %2028 = dma.hbm_to_vmem [thread:$0]  (!%p2026_p10), %s131_s22, 3072, %s133_s25, [#allocation6], %s2409_s29, %s2409_s29, %s2410_s30  }
  0x13   : > { %2031 = dma.hbm_to_vmem [thread:$0]  (!%p2026_p10), %s146_s28, 48, %s148_s5, [#allocation6]  }
  0x14   : > { %p34_p12 = scmp.ne.s32.totalorder %s2402_s14, %s2398_s13  ;;  %p25_p13 = scmp.eq.s32.totalorder %s24_s8, 0 }
  0x15   : > { %p35_p0 = scmp.eq.s32.totalorder %s2406_s15, 0  ;;  %p2042_p5 = scmp.lt.s32.totalorder %s2406_s15, 2 }
  0x16   : > { %p2502_p3 = por %p106_p2, %p34_p12  ;;  %s158_s11 = sand.u32 1, %s2402_s14  }
  0x17   : > { %s2508_s10 = scalar_select %p25_p13, %s2402_s14, %s27_s7  }
  0x18   : > { %p36_p7 = por %p35_p0, %p34_p12  ;;  %s1850_s17 = sshll.u32 %s158_s11, 8 }
  0x19   : > { %s1962_s20 = sshll.u32 %s2406_s15, 8  ;;  %s162_s25 = scalar_lea.vmem [#allocation2], %s1850_s17 }
  0x1a   : > { %s168_s24 = scalar_lea.hbm %s3268_s0, %s1962_s20  ;;  %s171_s26 = sshll.u32 %s162_s25, 4  ;;  %s172_s26 = int_to_ptr.vmem [resolvable:$true] %s171_s26 }
  0x1b   : > { %s169_s27 = sshll.u32 %s168_s24, 4  ;;  %p2515_p2 = pnand %p2042_p5, %p36_p7  ;;  %s170_s27 = int_to_ptr.hbm [resolvable:$true] %s169_s27 }
  0x1c   : > { %s159_s29 = scalar_lea.sflag [#allocation3], %s158_s11  ;;  %s2306_s30 = sshra.s32 %s170_s27, 4  ;;  %s2307_s30 = int_to_ptr.hbm [resolvable:$true] %s2306_s30 }
  0x1d   : > { %s2308_s4 = scalar_lea.hbm %s2307_s30, 256  ;;  %p2310_p10 = pneg %p2515_p2 }
  0x1e   : > { %p2309_p9 = scmp.ne.s32.totalorder %s2307_s30, %s2308_s4  ;;  %s2313_s8 = scalar_lea.hbm %s3268_s0, 512 }
  0x1f   : > { %p2314_p0 = scmp.lt.s32.totalorder %s2307_s30, %s3268_s0  ;;  %p2315_p5 = scmp.lt.s32.totalorder %s2313_s8, %s2308_s4 }
  0x20   : > { %p2311_p12 = pnand %p2310_p10, %p2309_p9 }
  0x21   : > { %p2316_p7 = por %p2315_p5, %p2314_p0 }
  0x22   : > { %p2312_p13 = pneg %p2311_p12 }
  0x24   : > { %p2317_p11 = pnand %p2316_p7, %p2312_p13 }
  0x26   : > { %2320 = shalt.err (!%p2317_p11)
}
  0x27   : > { %s2412_s11 = smov 128   ;;  %s2413_s21 = smov 8  }
  0x28   : > { %2035 = dma.hbm_to_vmem [thread:$0]  (!%p2515_p2), %s170_s27, 4096, %s172_s26, %s159_s29, %s2412_s11, %s2412_s11, %s2413_s21  }
  0x29   : > { %183 = sbr.rel (%p2479_p8) target bundleno = 1252 (0x4e4), region = 32  ;;  %s2532_s22 = sand.u32 (!%p2479_p8), 1, %s2398_s13  }
  0x2a   : > { %s1855_s24 = sshll.u32 (!%p2479_p8), %s2532_s22, 8  ;;  %s186_s25 = scalar_lea.sflag (!%p2479_p8), [#allocation3], %s2532_s22 }
  0x2b   : > { %s2538_s30 = scalar_lea.vmem (!%p2479_p8), [#allocation2], %s1855_s24 }
  0x2e   : > { %2381 = dma.done.wait (%p2466_p4), %s186_s25, 4096  }
  0x2f   : > { %2383 = vsyncadd (%p2466_p4), %s186_s25, 4294963200 }
  0x30   : > { %2385 = dma.done.wait (%p41_p1), [#allocation6], 3120  }
  0x31   : > { %2387 = vsyncadd (%p41_p1), [#allocation6], 4294964176  ;;  %v1984_v0 = vld [vmem:[#allocation5 + $0xac] sm:$0xf]  ;;  %v1947_v1 = vld [vmem:[#allocation5 + $0xb4] sm:$0xf0] }
  0x32   : > { %v1981_v2 = vld [vmem:[#allocation5 + $0x94] sm:$0xf]  ;;  %v1950_v3 = vor.u32 %v1984_v0, %v1947_v1  ;;  %v1935_v4 = vld [vmem:[#allocation5 + $0x9c] sm:$0xf0]  ;;  %v1978_v6 = vld [vmem:[#allocation5 + $0x7c] sm:$0xf] }
  0x33   : > { %v1938_v5 = vor.u32 %v1981_v2, %v1935_v4  ;;  %v1923_v7 = vld [vmem:[#allocation5 + $0x84] sm:$0xf0]  ;;  %v1975_v9 = vld [vmem:[#allocation5 + $0x64] sm:$0xf]  ;;  %v1911_v10 = vld [vmem:[#allocation5 + $0x6c] sm:$0xf0] }
  0x34   : > { %530 = vmatpush.bf16.msra.mxu1 %v1950_v3  ;;  %1997 = vmatpush.bf16.msra.mxu3 %v1950_v3  ;;  %v1926_v8 = vor.u32 %v1978_v6, %v1923_v7  ;;  %v1914_v11 = vor.u32 %v1975_v9, %v1911_v10  ;;  %v1972_v12 = vld [vmem:[#allocation5 + $0x4c] sm:$0xf]  ;;  %v1899_v13 = vld [vmem:[#allocation5 + $0x54] sm:$0xf0]  ;;  %v1969_v15 = vld [vmem:[#allocation5 + $0x34] sm:$0xf] }
  0x35   : > { %v1902_v14 = vor.u32 %v1972_v12, %v1899_v13  ;;  %v1887_v16 = vld [vmem:[#allocation5 + $0x3c] sm:$0xf0]  ;;  %v1966_v18 = vld [vmem:[#allocation5 + $0x1c] sm:$0xf]  ;;  %v1875_v19 = vld [vmem:[#allocation5 + $0x24] sm:$0xf0] }
  0x36   : > { %v1890_v17 = vor.u32 %v1969_v15, %v1887_v16  ;;  %v1878_v20 = vor.u32 %v1966_v18, %v1875_v19  ;;  %v1963_v21 = vld [vmem:[#allocation5 + $0x4] sm:$0xf]  ;;  %v1863_v22 = vld [vmem:[#allocation5 + $0xc] sm:$0xf0]  ;;  %v226_v25 = vld [vmem:[%s2538_s30 + $0x8] sm:$0xff]  ;;  %s3134_s18 = scalar_lea.vmem [#allocation8], %s1855_s24 }
  0x37   : > { %v1866_v23 = vor.u32 %v1963_v21, %v1863_v22  ;;  %v225_v24 = vld [vmem:[%s2538_s30] sm:$0xff]  ;;  %v227_v27 = vld [vmem:[%s2538_s30 + $0x10] sm:$0xff]  ;;  %v228_v28 = vld [vmem:[%s2538_s30 + $0x18] sm:$0xff]  ;;  %s1988_s23 = sshll.u32 %s2457_s16, 8  ;;  %s1750_s29 = sshll.u32 %s3134_s18, 4  ;;  %s1751_s29 = int_to_ptr.vmem [resolvable:$true] %s1750_s29 }
  0x38   : > { %531 = vmatpush.bf16.msra.mxu1 %v1938_v5  ;;  %1998 = vmatpush.bf16.msra.mxu3 %v1938_v5  ;;  %v2550_v26 = vpack.c.bf16 %v226_v25, %v225_v24  ;;  %v2555_v29 = vpack.c.bf16 %v228_v28, %v227_v27  ;;  %v229_v30 = vld [vmem:[%s2538_s30 + $0x20] sm:$0xff]  ;;  %v230_v31 = vld [vmem:[%s2538_s30 + $0x28] sm:$0xff]  ;;  %v231_v33 = vld [vmem:[%s2538_s30 + $0x30] sm:$0xff]  ;;  %s1749_s28 = scalar_lea.hbm %s3271_s3, %s1988_s23  ;;  %s1737_s16 = scalar_lea.sflag [#allocation4], %s2532_s22 }
  0x39   : > { %v2560_v32 = vpack.c.bf16 %v230_v31, %v229_v30  ;;  %v232_v34 = vld [vmem:[%s2538_s30 + $0x38] sm:$0xff]  ;;  %v233_v36 = vld [vmem:[%s2538_s30 + $0x40] sm:$0xff]  ;;  %v234_v37 = vld [vmem:[%s2538_s30 + $0x48] sm:$0xff]  ;;  %s1752_s4 = sshll.u32 %s1749_s28, 4  ;;  %s2356_s20 = scalar_lea.hbm %s3271_s3, 512  ;;  %s1753_s4 = int_to_ptr.hbm [resolvable:$true] %s1752_s4 }
  0x3a   : > { %v2565_v35 = vpack.c.bf16 %v232_v34, %v231_v33  ;;  %v2570_v38 = vpack.c.bf16 %v234_v37, %v233_v36  ;;  %v1945_v39 = vld [vmem:[#allocation5 + $0xa8] sm:$0xf]  ;;  %v1985_v40 = vld [vmem:[#allocation5 + $0xb0] sm:$0xf0]  ;;  %v1933_v41 = vld [vmem:[#allocation5 + $0x90] sm:$0xf] }
  0x3b   : > { %v1946_v42 = vor.u32 %v1985_v40, %v1945_v39  ;;  %v1982_v43 = vld [vmem:[#allocation5 + $0x98] sm:$0xf0]  ;;  %v235_v45 = vld [vmem:[%s2538_s30 + $0x50] sm:$0xff]  ;;  %v249_v48 = vld [vmem:[%s2538_s30 + $0xc0] sm:$0xff]  ;;  %s2350_s5 = sshra.s32 %s1753_s4, 4  ;;  %s2351_s5 = int_to_ptr.hbm [resolvable:$true] %s2350_s5 }
  0x3c   : > { %532 = vmatpush.bf16.msra.mxu1 %v1926_v8  ;;  %1999 = vmatpush.bf16.msra.mxu3 %v1926_v8  ;;  %v1934_v44 = vor.u32 %v1982_v43, %v1933_v41  ;;  %v236_v46 = vld [vmem:[%s2538_s30 + $0x58] sm:$0xff]  ;;  %v250_v49 = vld [vmem:[%s2538_s30 + $0xc8] sm:$0xff]  ;;  %v1979_v52 = vld [vmem:[#allocation5 + $0x80] sm:$0xf0]  ;;  %s2352_s7 = scalar_lea.hbm %s2351_s5, 256  ;;  %p2357_p11 = scmp.lt.s32.totalorder %s2351_s5, %s3271_s3 }
  0x3d   : > { %1989 = vmatpush.bf16.msra.mxu2 %v1946_v42  ;;  %441 = vmatpush.bf16.msra.mxu0 %v1946_v42  ;;  %v2575_v47 = vpack.c.bf16 %v236_v46, %v235_v45  ;;  %v1921_v50 = vld [vmem:[#allocation5 + $0x78] sm:$0xf]  ;;  %v2580_v51 = vpack.c.bf16 %v250_v49, %v249_v48  ;;  %v1909_v53 = vld [vmem:[#allocation5 + $0x60] sm:$0xf]  ;;  %v1976_v54 = vld [vmem:[#allocation5 + $0x68] sm:$0xf0]  ;;  %p2353_p1 = scmp.ne.s32.totalorder %s2351_s5, %s2352_s7  ;;  %p2358_p2 = scmp.lt.s32.totalorder %s2356_s20, %s2352_s7 }
  0x3e   : > { %v1922_v55 = vor.u32 %v1979_v52, %v1921_v50  ;;  %v1910_v56 = vor.u32 %v1976_v54, %v1909_v53  ;;  %v1897_v57 = vld [vmem:[#allocation5 + $0x48] sm:$0xf]  ;;  %v1973_v58 = vld [vmem:[#allocation5 + $0x50] sm:$0xf0]  ;;  %v237_v60 = vld [vmem:[%s2538_s30 + $0x60] sm:$0xff] }
  0x3f   : > { %v1898_v59 = vor.u32 %v1973_v58, %v1897_v57  ;;  %v238_v61 = vld [vmem:[%s2538_s30 + $0x68] sm:$0xff]  ;;  %v251_v63 = vld [vmem:[%s2538_s30 + $0xd0] sm:$0xff]  ;;  %v252_v0 = vld [vmem:[%s2538_s30 + $0xd8] sm:$0xff]  ;;  %p2354_p4 = pnand %p2353_p1, %p2502_p3  ;;  %p2359_p9 = por %p2358_p2, %p2357_p11 }
  0x40   : > { %533 = vmatpush.bf16.msra.mxu1 %v1914_v11  ;;  %2000 = vmatpush.bf16.msra.mxu3 %v1914_v11  ;;  %v2585_v62 = vpack.c.bf16 %v238_v61, %v237_v60  ;;  %v2590_v1 = vpack.c.bf16 %v252_v0, %v251_v63  ;;  %v1885_v2 = vld [vmem:[#allocation5 + $0x30] sm:$0xf]  ;;  %v1970_v3 = vld [vmem:[#allocation5 + $0x38] sm:$0xf0]  ;;  %v1873_v4 = vld [vmem:[#allocation5 + $0x18] sm:$0xf] }
  0x41   : > { %1990 = vmatpush.bf16.msra.mxu2 %v1934_v44  ;;  %442 = vmatpush.bf16.msra.mxu0 %v1934_v44  ;;  %v1886_v5 = vor.u32 %v1970_v3, %v1885_v2  ;;  %v1967_v6 = vld [vmem:[#allocation5 + $0x20] sm:$0xf0]  ;;  %v239_v8 = vld [vmem:[%s2538_s30 + $0x70] sm:$0xff]  ;;  %v240_v9 = vld [vmem:[%s2538_s30 + $0x78] sm:$0xff]  ;;  %p2355_p8 = pneg %p2354_p4 }
  0x42   : > { %v1874_v7 = vor.u32 %v1967_v6, %v1873_v4  ;;  %v1861_v10 = vld [vmem:[#allocation5] sm:$0xf]  ;;  %v1964_v11 = vld [vmem:[#allocation5 + $0x8] sm:$0xf0]  ;;  %v2595_v13 = vpack.c.bf16 %v240_v9, %v239_v8  ;;  %v1953_v19 = vld [vmem:[#allocation5 + $0xb0] sm:$0xf] }
  0x43   : > { %v1862_v12 = vor.u32 %v1964_v11, %v1861_v10  ;;  %v254_v15 = vld [vmem:[%s2538_s30 + $0xe8] sm:$0xff]  ;;  %v255_v24 = vld [vmem:[%s2538_s30 + $0xf0] sm:$0xff]  ;;  %v256_v25 = vld [vmem:[%s2538_s30 + $0xf8] sm:$0xff]  ;;  %p2360_p10 = pnand %p2359_p9, %p2355_p8 }
  0x44   : > { %534 = vmatpush.bf16.msra.mxu1 %v1902_v14  ;;  %2001 = vmatpush.bf16.msra.mxu3 %v1902_v14  ;;  %v253_v14 = vld [vmem:[%s2538_s30 + $0xe0] sm:$0xff]  ;;  %v242_v18 = vld [vmem:[%s2538_s30 + $0x88] sm:$0xff]  ;;  %v2615_v27 = vpack.c.bf16 %v256_v25, %v255_v24  ;;  %v1941_v28 = vld [vmem:[#allocation5 + $0x98] sm:$0xf] }
  0x45   : > { %1991 = vmatpush.bf16.msra.mxu2 %v1922_v55  ;;  %443 = vmatpush.bf16.msra.mxu0 %v1922_v55  ;;  %v2601_v16 = vpack.c.bf16 %v254_v15, %v253_v14  ;;  %v1983_v30 = vld [vmem:[#allocation5 + $0xa0] sm:$0xf0]  ;;  %v1929_v31 = vld [vmem:[#allocation5 + $0x80] sm:$0xf]  ;;  %v1980_v34 = vld [vmem:[#allocation5 + $0x88] sm:$0xf0] }
  0x46   : > { %v1942_v33 = vor.u32 %v1983_v30, %v1941_v28  ;;  %v1930_v37 = vor.u32 %v1980_v34, %v1929_v31  ;;  %v243_v39 = vld [vmem:[%s2538_s30 + $0x90] sm:$0xff]  ;;  %v244_v40 = vld [vmem:[%s2538_s30 + $0x98] sm:$0xff]  ;;  %v1917_v41 = vld [vmem:[#allocation5 + $0x68] sm:$0xf] }
  0x47   : > { %v1977_v42 = vld [vmem:[#allocation5 + $0x70] sm:$0xf0]  ;;  %v1905_v43 = vld [vmem:[#allocation5 + $0x50] sm:$0xf]  ;;  %v1974_v45 = vld [vmem:[#allocation5 + $0x58] sm:$0xf0]  ;;  %v2623_v46 = vpack.c.bf16 %v244_v40, %v243_v39 }
  0x48   : > { %535 = vmatpush.bf16.msra.mxu1 %v1890_v17  ;;  %2002 = vmatpush.bf16.msra.mxu3 %v1890_v17  ;;  %v241_v17 = vld [vmem:[%s2538_s30 + $0x80] sm:$0xff]  ;;  %v1918_v44 = vor.u32 %v1977_v42, %v1917_v41  ;;  %v1906_v49 = vor.u32 %v1974_v45, %v1905_v43  ;;  %v1893_v50 = vld [vmem:[#allocation5 + $0x38] sm:$0xf]  ;;  %v1968_v55 = vld [vmem:[#allocation5 + $0x28] sm:$0xf0] }
  0x49   : > { %1992 = vmatpush.bf16.msra.mxu2 %v1910_v56  ;;  %444 = vmatpush.bf16.msra.mxu0 %v1910_v56  ;;  %v2607_v22 = vpack.c.bf16 %v242_v18, %v241_v17  ;;  %v1971_v52 = vld [vmem:[#allocation5 + $0x40] sm:$0xf0]  ;;  %v1881_v53 = vld [vmem:[#allocation5 + $0x20] sm:$0xf]  ;;  %v1869_v60 = vld [vmem:[#allocation5 + $0x8] sm:$0xf] }
  0x4a   : > { %v1894_v54 = vor.u32 %v1971_v52, %v1893_v50  ;;  %v1882_v57 = vor.u32 %v1968_v55, %v1881_v53  ;;  %v245_v58 = vld [vmem:[%s2538_s30 + $0xa0] sm:$0xff]  ;;  %v1965_v61 = vld [vmem:[#allocation5 + $0x10] sm:$0xf0] }
  0x4b   : > { %v1870_v63 = vor.u32 %v1965_v61, %v1869_v60  ;;  %v247_v4 = vld [vmem:[%s2538_s30 + $0xb0] sm:$0xff] }
  0x4c   : > { %536 = vmatpush.bf16.msra.mxu1 %v1878_v20  ;;  %2003 = vmatpush.bf16.msra.mxu3 %v1878_v20  ;;  %v1986_v20 = vld [vmem:[#allocation5 + $0xb8] sm:$0xf0] }
  0x4d   : > { %1993 = vmatpush.bf16.msra.mxu2 %v1898_v59  ;;  %445 = vmatpush.bf16.msra.mxu0 %v1898_v59  ;;  %v1954_v21 = vor.u32 %v1986_v20, %v1953_v19  ;;  %v246_v59 = vld [vmem:[%s2538_s30 + $0xa8] sm:$0xff] }
  0x4e   : > { %v2634_v0 = vpack.c.bf16 %v246_v59, %v245_v58 }
  0x50   : > { %537 = vmatpush.bf16.msra.mxu1 %v1866_v23  ;;  %2004 = vmatpush.bf16.msra.mxu3 %v1866_v23 }
  0x51   : > { %1994 = vmatpush.bf16.msra.mxu2 %v1886_v5  ;;  %446 = vmatpush.bf16.msra.mxu0 %v1886_v5  ;;  %v248_v5 = vld [vmem:[%s2538_s30 + $0xb8] sm:$0xff] }
  0x52   : > { %v2645_v6 = vpack.c.bf16 %v248_v5, %v247_v4 }
  0x53   : > { %538 = vmatmul.bf16.vlgmr.msra.gmra.mxu1 %v2550_v26  ;;  %598 = vmatmul.bf16.vlgmr.msra.gmra.mxu3 %v2580_v51 }
  0x55   : > { %1995 = vmatpush.bf16.msra.mxu2 %v1874_v7  ;;  %447 = vmatpush.bf16.msra.mxu0 %v1874_v7 }
  0x59   : > { %1996 = vmatpush.bf16.msra.mxu2 %v1862_v12  ;;  %448 = vmatpush.bf16.msra.mxu0 %v1862_v12 }
  0x5c   : > { %514 = vmatmul.bf16.vlgmr.msra.gmra.mxu2 %v2590_v1  ;;  %449 = vmatmul.bf16.vlgmr.msra.gmra.mxu0 %v2550_v26 }
  0x5d   : > { %619 = vmatpush.bf16.msrb.mxu2 %v1954_v21 }
  0x61   : > { %620 = vmatpush.bf16.msrb.mxu2 %v1942_v33 }
  0x63   : > { %543 = vmatmul.bf16.gmra.mxu1 %v2555_v29  ;;  %603 = vmatmul.bf16.gmra.mxu3 %v2590_v1 }
  0x65   : > { %621 = vmatpush.bf16.msrb.mxu2 %v1930_v37 }
  0x69   : > { %622 = vmatpush.bf16.msrb.mxu2 %v1918_v44 }
  0x6c   : > { %519 = vmatmul.bf16.gmra.mxu2 %v2601_v16  ;;  %454 = vmatmul.bf16.gmra.mxu0 %v2555_v29 }
  0x6d   : > { %623 = vmatpush.bf16.msrb.mxu2 %v1906_v49 }
  0x71   : > { %624 = vmatpush.bf16.msrb.mxu2 %v1894_v54 }
  0x73   : > { %548 = vmatmul.bf16.gmra.mxu1 %v2560_v32  ;;  %608 = vmatmul.bf16.gmra.mxu3 %v2601_v16 }
  0x75   : > { %625 = vmatpush.bf16.msrb.mxu2 %v1882_v57 }
  0x79   : > { %626 = vmatpush.bf16.msrb.mxu2 %v1870_v63 }
  0x7c   : > { %524 = vmatmul.bf16.gmra.mxu2 %v2615_v27  ;;  %459 = vmatmul.bf16.gmra.mxu0 %v2560_v32 }
  0x83   : > { %553 = vmatmul.bf16.gmra.mxu1 %v2565_v35  ;;  %613 = vmatmul.bf16.gmra.mxu3 %v2615_v27 }
  0x8c   : > { %627 = vmatmul.bf16.vlgmr.msrb.gmra.mxu2 %v2550_v26  ;;  %464 = vmatmul.bf16.gmra.mxu0 %v2565_v35 }
  0x93   : > { %558 = vmatmul.bf16.gmra.mxu1 %v2570_v38 }
  0x9c   : > { %632 = vmatmul.bf16.gmra.mxu2 %v2555_v29  ;;  %469 = vmatmul.bf16.gmra.mxu0 %v2570_v38 }
  0xa3   : > { %563 = vmatmul.bf16.gmra.mxu1 %v2575_v47 }
  0xac   : > { %637 = vmatmul.bf16.gmra.mxu2 %v2560_v32  ;;  %474 = vmatmul.bf16.gmra.mxu0 %v2575_v47  ;;  %v2664_v32 = vld [vmem:[#allocation7] sm:$0x7] }
  0xad   : > { %v2667_v18 = vperm.slane %v2664_v32, 1 }
  0xb3   : > { %568 = vmatmul.bf16.gmra.mxu1 %v2585_v62 }
  0xbc   : > { %642 = vmatmul.bf16.gmra.mxu2 %v2565_v35  ;;  %479 = vmatmul.bf16.gmra.mxu0 %v2585_v62 }
  0xc3   : > { %573 = vmatmul.bf16.gmra.mxu1 %v2595_v13 }
  0xcc   : > { %647 = vmatmul.bf16.gmra.mxu2 %v2570_v38  ;;  %484 = vmatmul.bf16.gmra.mxu0 %v2595_v13 }
  0xd0   : > { %v2609_v23 = vpop.f32.mrf.mxu1 }
  0xd3   : > { %578 = vmatmul.bf16.gmra.mxu1 %v2607_v22 }
  0xd6   : > { %v2658_v14 = vpop.f32.mrf.mxu3 }
  0xd8   : > { %v2619_v36 = vpop.f32.mrf.mxu1 }
  0xd9   : > { %v2683_v42 = vpop.f32.mrf.mxu0 }
  0xdc   : > { %652 = vmatmul.bf16.gmra.mxu2 %v2575_v47  ;;  %489 = vmatmul.bf16.gmra.mxu0 %v2607_v22 }
  0xde   : > { %v2662_v15 = vpop.f32.mrf.mxu3 }
  0xdf   : > { %v2674_v38 = vpop.f32.mrf.mxu2 }
  0xe0   : > { %v2625_v48 = vpop.f32.mrf.mxu1 }
  0xe1   : > { %v2695_v61 = vpop.f32.mrf.mxu0 }
  0xe3   : > { %583 = vmatmul.bf16.gmra.mxu1 %v2623_v46 }
  0xe6   : > { %v2672_v19 = vpop.f32.mrf.mxu3 }
  0xe7   : > { %v2679_v47 = vpop.f32.mrf.mxu2 }
  0xe8   : > { %v2630_v56 = vpop.f32.mrf.mxu1 }
  0xec   : > { %657 = vmatmul.bf16.gmra.mxu2 %v2585_v62  ;;  %494 = vmatmul.bf16.gmra.mxu0 %v2623_v46 }
  0xee   : > { %v2681_v39 = vpop.f32.mrf.mxu3 }
  0xef   : > { %v2690_v52 = vpop.f32.mrf.mxu2 }
  0xf0   : > { %v2636_v2 = vpop.f32.mrf.mxu1 }
  0xf3   : > { %588 = vmatmul.bf16.gmra.mxu1 %v2634_v0 }
  0xf6   : > { %v2692_v59 = vpop.f32.mrf.mxu3 }
  0xf8   : > { %v2641_v3 = vpop.f32.mrf.mxu1 }
  0xfc   : > { %662 = vmatmul.bf16.gmra.mxu2 %v2595_v13  ;;  %499 = vmatmul.bf16.gmra.mxu0 %v2634_v0 }
 0x100   : > { %v2647_v7 = vpop.f32.mrf.mxu1 }
 0x103   : > { %593 = vmatmul.bf16.gmra.mxu1 %v2645_v6 }
 0x108   : > { %v2652_v8 = vpop.f32.mrf.mxu1 }
 0x10c   : > { %667 = vmatmul.bf16.gmra.mxu2 %v2607_v22  ;;  %504 = vmatmul.bf16.gmra.mxu0 %v2645_v6 }
 0x110   : > { %v559_v9 = vpop.f32.mrf.mxu1 }
 0x118   : > { %v561_v26 = vpop.f32.mrf.mxu1 }
 0x119   : > { %v562_v62 = vadd.f32 %v561_v26, %v2667_v18  ;;  %v557_v26 = vadd.f32 %v2652_v8, %v2667_v18  ;;  %v552_v8 = vadd.f32 %v2641_v3, %v2667_v18 }
 0x11c   : > { %672 = vmatmul.bf16.gmra.mxu2 %v2623_v46  ;;  %509 = vmatmul.bf16.gmra.mxu0 %v2580_v51 }
 0x120   : > { %v564_v10 = vpop.f32.mrf.mxu1 }
 0x121   : > { %v565_v49 = vadd.f32 %v564_v10, %v2667_v18  ;;  %v560_v10 = vadd.f32 %v559_v9, %v2667_v18  ;;  %v555_v9 = vadd.f32 %v2647_v7, %v2667_v18 }
 0x123   : > { %v750_v58 = vpack.c.bf16 %v565_v49, %v565_v49  ;;  %v745_v49 = vpack.c.bf16 %v552_v8, %v552_v8 }
 0x125   : > { %v841_v3 = vunpack.c.l.b16 %v745_v49 }
 0x128   : > { %v566_v11 = vpop.f32.mrf.mxu1 }
 0x129   : > { %v567_v43 = vadd.f32 %v566_v11, %v2667_v18  ;;  %v846_v11 = vunpack.c.l.b16 %v750_v58 }
 0x12b   : > { %v751_v53 = vpack.c.bf16 %v567_v43, %v567_v43  ;;  %v550_v43 = vadd.f32 %v2636_v2, %v2667_v18  ;;  %v545_v2 = vadd.f32 %v2625_v48, %v2667_v18 }
 0x12d   : > { %v847_v63 = vunpack.c.l.b16 %v751_v53 }
 0x130   : > { %v569_v12 = vpop.f32.mrf.mxu1 }
 0x131   : > { %v570_v30 = vadd.f32 %v569_v12, %v2667_v18 }
 0x133   : > { %v752_v41 = vpack.c.bf16 %v570_v30, %v570_v30 }
 0x135   : > { %v848_v50 = vunpack.c.l.b16 %v752_v41 }
 0x138   : > { %v571_v29 = vpop.f32.mrf.mxu1 }
 0x139   : > { %v572_v25 = vadd.f32 %v571_v29, %v2667_v18  ;;  %v2703_v29 = vpop.f32.mrf.mxu2  ;;  %677 = vmatmul.bf16.gmra.mxu2 %v2634_v0 }
 0x13b   : > { %v753_v34 = vpack.c.bf16 %v572_v25, %v572_v25 }
 0x13d   : > { %v849_v44 = vunpack.c.l.b16 %v753_v34  ;;  %v747_v34 = vpack.c.bf16 %v557_v26, %v557_v26 }
 0x13f   : > { %v858_v54 = vpack.c.b16 %v849_v44, %v848_v50  ;;  %v843_v13 = vunpack.c.l.b16 %v747_v34 }
 0x140   : > { %v574_v17 = vpop.f32.mrf.mxu1 }
 0x141   : > { %v575_v35 = vadd.f32 %v574_v17, %v2667_v18  ;;  %v749_v17 = vpack.c.bf16 %v562_v62, %v562_v62 }
 0x143   : > { %v754_v21 = vpack.c.bf16 %v575_v35, %v575_v35  ;;  %v857_v35 = vpack.c.b16 %v847_v63, %v846_v11  ;;  %v845_v25 = vunpack.c.l.b16 %v749_v17 }
 0x145   : > { %v850_v31 = vunpack.c.l.b16 %v754_v21  ;;  %v748_v21 = vpack.c.bf16 %v560_v10, %v560_v10  ;;  %v742_v10 = vpack.c.bf16 %v545_v2, %v545_v2 }
 0x147   : > { %v844_v30 = vunpack.c.l.b16 %v748_v21  ;;  %v540_v21 = vadd.f32 %v2609_v23, %v2667_v18  ;;  %v838_v26 = vunpack.c.l.b16 %v742_v10 }
 0x148   : > { %v576_v20 = vpop.f32.mrf.mxu1 }
 0x149   : > { %v577_v24 = vadd.f32 %v576_v20, %v2667_v18  ;;  %v740_v8 = vpack.c.bf16 %v540_v21, %v540_v21 }
 0x14b   : > { %v755_v28 = vpack.c.bf16 %v577_v24, %v577_v24  ;;  %v2707_v24 = vpop.f32.mrf.mxu0 }
 0x14d   : > { %v851_v33 = vunpack.c.l.b16 %v755_v28  ;;  %v611_v28 = vpop.f32.mrf.mxu3 }
 0x14f   : > { %v859_v37 = vpack.c.b16 %v851_v33, %v850_v31  ;;  %v2717_v33 = vpop.f32.mrf.mxu2 }
 0x150   : > { %v579_v40 = vpop.f32.mrf.mxu1 }
 0x151   : > { %868 = vmatpush.bf16.xpose.msrb.mxu3 %v859_v37  ;;  %v580_v45 = vadd.f32 %v579_v40, %v2667_v18  ;;  %v856_v37 = vpack.c.b16 %v845_v25, %v844_v30  ;;  %v746_v40 = vpack.c.bf16 %v555_v9, %v555_v9  ;;  %v2750_v25 = vperm.slane %v2664_v32, 0 }
 0x153   : > { %v756_v55 = vpack.c.bf16 %v580_v45, %v580_v45  ;;  %v2719_v41 = vpop.f32.mrf.mxu0  ;;  %v842_v44 = vunpack.c.l.b16 %v746_v40  ;;  %v451_v23 = vadd.f32 %v2683_v42, %v2750_v25 }
 0x155   : > { %v2698_v4 = vunpack.c.l.b16 %v756_v55  ;;  %v614_v7 = vpop.f32.mrf.mxu3  ;;  %v855_v50 = vpack.c.b16 %v843_v13, %v842_v44  ;;  %v610_v13 = vadd.f32 %v2692_v59, %v2667_v18  ;;  %v453_v44 = vadd.f32 %v2695_v61, %v2750_v25 }
 0x156   : > { %v836_v59 = vunpack.c.l.b16 %v740_v8  ;;  %v605_v61 = vadd.f32 %v2672_v19, %v2667_v18  ;;  %v600_v8 = vadd.f32 %v2658_v14, %v2667_v18 }
 0x157   : > { %v2725_v45 = vpop.f32.mrf.mxu2  ;;  %v709_v2 = vpack.c.bf16 %v453_v44, %v453_v44  ;;  %682 = vmatmul.bf16.gmra.mxu2 %v2645_v6 }
 0x158   : > { %v581_v57 = vpop.f32.mrf.mxu1 }
 0x159   : > { %869 = vmatpush.bf16.xpose.msrb.mxu3 %v858_v54  ;;  %v582_v60 = vadd.f32 %v581_v57, %v2667_v18  ;;  %v744_v54 = vpack.c.bf16 %v550_v43, %v550_v43  ;;  %v547_v57 = vadd.f32 %v2630_v56, %v2667_v18  ;;  %v615_v56 = vadd.f32 %v614_v7, %v2667_v18 }
 0x15b   : > { %v757_v5 = vpack.c.bf16 %v582_v60, %v582_v60  ;;  %v2729_v55 = vpop.f32.mrf.mxu0  ;;  %v840_v58 = vunpack.c.l.b16 %v744_v54  ;;  %v743_v62 = vpack.c.bf16 %v547_v57, %v547_v57  ;;  %v770_v9 = vpack.c.bf16 %v615_v56, %v615_v56 }
 0x15c   : > { %v768_v57 = vpack.c.bf16 %v610_v13, %v610_v13  ;;  %v789_v56 = vunpack.c.l.b16 %v709_v2  ;;  %v602_v13 = vadd.f32 %v2662_v15, %v2667_v18 }
 0x15d   : > { %v2701_v12 = vunpack.c.l.b16 %v757_v5  ;;  %v854_v63 = vpack.c.b16 %v841_v3, %v840_v58  ;;  %v616_v5 = vpop.f32.mrf.mxu3  ;;  %v839_v48 = vunpack.c.l.b16 %v743_v62  ;;  %v995_v43 = vunpack.c.l.b16 %v770_v9 }
 0x15e   : > { %v617_v17 = vadd.f32 %v616_v5, %v2667_v18  ;;  %v708_v3 = vpack.c.bf16 %v451_v23, %v451_v23  ;;  %v993_v5 = vunpack.c.l.b16 %v768_v57 }
 0x15f   : > { %v997_v20 = vpack.c.b16 %v2701_v12, %v2698_v4  ;;  %v2737_v60 = vpop.f32.mrf.mxu2  ;;  %v853_v40 = vpack.c.b16 %v839_v48, %v838_v26  ;;  %v766_v48 = vpack.c.bf16 %v605_v61, %v605_v61 }
 0x160   : > { %v2715_v31 = vpop.f32.mrf.mxu1  ;;  %v771_v30 = vpack.c.bf16 %v617_v17, %v617_v17  ;;  %v788_v10 = vunpack.c.l.b16 %v708_v3 }
 0x161   : > { %870 = vmatpush.bf16.xpose.msrb.mxu3 %v857_v35  ;;  %v542_v35 = vadd.f32 %v2619_v36, %v2667_v18  ;;  %v612_v36 = vadd.f32 %v611_v28, %v2667_v18  ;;  %v991_v19 = vunpack.c.l.b16 %v766_v48 }
 0x162   : > { %v996_v7 = vunpack.c.l.b16 %v771_v30  ;;  %v804_v26 = vpack.c.b16 %v789_v56, %v788_v10 }
 0x163   : > { %v2743_v22 = vpop.f32.mrf.mxu0  ;;  %v769_v28 = vpack.c.bf16 %v612_v36, %v612_v36 }
 0x164   : > { %v1004_v58 = vpack.c.b16 %v996_v7, %v995_v43 }
 0x165   : > { %v994_v46 = vunpack.c.l.b16 %v769_v28 }
 0x167   : > { %v2752_v34 = vpop.f32.mrf.mxu2  ;;  %v1003_v9 = vpack.c.b16 %v994_v46, %v993_v5  ;;  %v461_v46 = vadd.f32 %v2729_v55, %v2750_v25  ;;  %v585_v55 = vadd.f32 %v2715_v31, %v2667_v18  ;;  %687 = vmatmul.bf16.gmra.mxu2 %v2580_v51 }
 0x168   : > { %v2727_v53 = vpop.f32.mrf.mxu1 }
 0x169   : > { %871 = vmatpush.bf16.xpose.msrb.mxu3 %v856_v37  ;;  %v741_v37 = vpack.c.bf16 %v542_v35, %v542_v35  ;;  %v758_v6 = vpack.c.bf16 %v585_v55, %v585_v55 }
 0x16b   : > { %v2761_v49 = vpop.f32.mrf.mxu0 }
 0x16c   : > { %v466_v31 = vadd.f32 %v2761_v49, %v2750_v25 }
 0x16f   : > { %v2765_v42 = vpop.f32.mrf.mxu2 }
 0x170   : > { %v2739_v11 = vpop.f32.mrf.mxu1 }
 0x171   : > { %872 = vmatpush.bf16.xpose.msrb.mxu3 %v855_v50  ;;  %v837_v50 = vunpack.c.l.b16 %v741_v37  ;;  %v590_v5 = vadd.f32 %v2739_v11, %v2667_v18  ;;  %v587_v11 = vadd.f32 %v2727_v53, %v2667_v18 }
 0x173   : > { %v852_v62 = vpack.c.b16 %v837_v50, %v836_v59  ;;  %v2771_v17 = vpop.f32.mrf.mxu0  ;;  %v764_v50 = vpack.c.bf16 %v600_v8, %v600_v8  ;;  %v765_v59 = vpack.c.bf16 %v602_v13, %v602_v13 }
 0x175   : > { %v989_v28 = vunpack.c.l.b16 %v764_v50  ;;  %v990_v3 = vunpack.c.l.b16 %v765_v59  ;;  %v983_v50 = vunpack.c.l.b16 %v758_v6 }
 0x177   : > { %v2773_v30 = vpop.f32.mrf.mxu2  ;;  %692 = vmatmul.bf16.gmra.mxu2 %v2590_v1 }
 0x178   : > { %v591_v54 = vpop.f32.mrf.mxu1 }
 0x179   : > { %873 = vmatpush.bf16.xpose.msrb.mxu3 %v854_v63  ;;  %v607_v63 = vadd.f32 %v2681_v39, %v2667_v18  ;;  %v456_v39 = vadd.f32 %v2707_v24, %v2750_v25  ;;  %v592_v10 = vadd.f32 %v591_v54, %v2667_v18 }
 0x17b   : > { %v767_v21 = vpack.c.bf16 %v607_v63, %v607_v63  ;;  %v2784_v36 = vpop.f32.mrf.mxu0  ;;  %v710_v23 = vpack.c.bf16 %v456_v39, %v456_v39  ;;  %v1001_v63 = vpack.c.b16 %v990_v3, %v989_v28 }
 0x17c   : > { %v471_v49 = vadd.f32 %v2784_v36, %v2750_v25 }
 0x17d   : > { %v992_v37 = vunpack.c.l.b16 %v767_v21  ;;  %v760_v21 = vpack.c.bf16 %v590_v5, %v590_v5 }
 0x17e   : > { %v716_v51 = vpack.c.bf16 %v471_v49, %v471_v49 }
 0x17f   : > { %v1002_v44 = vpack.c.b16 %v992_v37, %v991_v19  ;;  %v2786_v7 = vpop.f32.mrf.mxu2 }
 0x180   : > { %v594_v35 = vpop.f32.mrf.mxu1 }
 0x181   : > { %874 = vmatpush.bf16.xpose.msrb.mxu3 %v853_v40  ;;  %v458_v40 = vadd.f32 %v2719_v41, %v2750_v25  ;;  %v790_v41 = vunpack.c.l.b16 %v710_v23  ;;  %v595_v0 = vadd.f32 %v594_v35, %v2667_v18  ;;  %v463_v35 = vadd.f32 %v2743_v22, %v2750_v25 }
 0x182   : > { %v759_v23 = vpack.c.bf16 %v587_v11, %v587_v11 }
 0x183   : > { %v711_v43 = vpack.c.bf16 %v458_v40, %v458_v40  ;;  %v762_v15 = vpack.c.bf16 %v595_v0, %v595_v0  ;;  %v472_v61 = vpop.f32.mrf.mxu0  ;;  %v713_v19 = vpack.c.bf16 %v463_v35, %v463_v35  ;;  %v985_v40 = vunpack.c.l.b16 %v760_v21 }
 0x184   : > { %v984_v59 = vunpack.c.l.b16 %v759_v23 }
 0x185   : > { %v791_v57 = vunpack.c.l.b16 %v711_v43  ;;  %v987_v56 = vunpack.c.l.b16 %v762_v15  ;;  %v793_v13 = vunpack.c.l.b16 %v713_v19 }
 0x187   : > { %v805_v2 = vpack.c.b16 %v791_v57, %v790_v41  ;;  %v998_v41 = vpack.c.b16 %v984_v59, %v983_v50  ;;  %v714_v57 = vpack.c.bf16 %v466_v31, %v466_v31 }
 0x188   : > { %v596_v24 = vpop.f32.mrf.mxu1 }
 0x189   : > { %875 = vmatpush.bf16.xpose.msrb.mxu3 %v852_v62  ;;  %v597_v14 = vadd.f32 %v596_v24, %v2667_v18  ;;  %v2790_v62 = vpop.f32.mrf.mxu2  ;;  %v468_v18 = vadd.f32 %v2771_v17, %v2750_v25  ;;  %v794_v28 = vunpack.c.l.b16 %v714_v57  ;;  %v473_v17 = vadd.f32 %v472_v61, %v2750_v25  ;;  %697 = vmatmul.bf16.gmra.mxu2 %v2601_v16 }
 0x18b   : > { %v475_v54 = vpop.f32.mrf.mxu0  ;;  %v715_v0 = vpack.c.bf16 %v468_v18, %v468_v18 }
 0x18c   : > { %v476_v36 = vadd.f32 %v475_v54, %v2750_v25  ;;  %v2827_v54 = vperm.slane %v2664_v32, 2 }
 0x18d   : > { %v795_v3 = vunpack.c.l.b16 %v715_v0 }
 0x18e   : > { %v718_v4 = vpack.c.bf16 %v476_v36, %v476_v36 }
 0x190   : > { %876 = vmatmul.bf16.vlgmr.msrb.gmra.mxu3 %v804_v26  ;;  %v761_v26 = vpack.c.bf16 %v592_v10, %v592_v10  ;;  %v796_v10 = vunpack.c.l.b16 %v716_v51  ;;  %v798_v1 = vunpack.c.l.b16 %v718_v4 }
 0x191   : > { %1013 = vmatpush.bf16.xpose.msra.mxu3 %v1004_v58  ;;  %v763_v58 = vpack.c.bf16 %v597_v14, %v597_v14  ;;  %v2800_v39 = vpop.f32.mrf.mxu2 }
 0x192   : > { %v986_v22 = vunpack.c.l.b16 %v761_v26 }
 0x193   : > { %v988_v48 = vunpack.c.l.b16 %v763_v58  ;;  %v477_v53 = vpop.f32.mrf.mxu0 }
 0x194   : > { %v999_v43 = vpack.c.b16 %v986_v22, %v985_v40  ;;  %v478_v61 = vadd.f32 %v477_v53, %v2750_v25 }
 0x195   : > { %v1000_v37 = vpack.c.b16 %v988_v48, %v987_v56 }
 0x196   : > { %v719_v12 = vpack.c.bf16 %v478_v61, %v478_v61 }
 0x198   : > { %v799_v26 = vunpack.c.l.b16 %v719_v12 }
 0x199   : > { %1014 = vmatpush.bf16.xpose.msra.mxu3 %v1003_v9  ;;  %v712_v9 = vpack.c.bf16 %v461_v46, %v461_v46  ;;  %v2806_v24 = vpop.f32.mrf.mxu2  ;;  %702 = vmatmul.bf16.gmra.mxu2 %v2615_v27 }
 0x19a   : > { %v809_v19 = vpack.c.b16 %v799_v26, %v798_v1 }
 0x19b   : > { %v792_v8 = vunpack.c.l.b16 %v712_v9  ;;  %v480_v15 = vpop.f32.mrf.mxu0 }
 0x19c   : > { %v481_v55 = vadd.f32 %v480_v15, %v2750_v25 }
 0x19e   : > { %v720_v16 = vpack.c.bf16 %v481_v55, %v481_v55 }
 0x1a0   : > { %881 = vmatmul.bf16.gmra.mxu3 %v805_v2  ;;  %v807_v2 = vpack.c.b16 %v795_v3, %v794_v28  ;;  %v800_v6 = vunpack.c.l.b16 %v720_v16 }
 0x1a1   : > { %1015 = vmatpush.bf16.xpose.msra.mxu3 %v1002_v44  ;;  %v806_v44 = vpack.c.b16 %v793_v13, %v792_v8  ;;  %v648_v14 = vpop.f32.mrf.mxu2 }
 0x1a2   : > { %v649_v0 = vadd.f32 %v648_v14, %v2827_v54  ;;  %v634_v14 = vadd.f32 %v2765_v42, %v2827_v54 }
 0x1a3   : > { %v482_v46 = vpop.f32.mrf.mxu0 }
 0x1a4   : > { %v483_v11 = vadd.f32 %v482_v46, %v2750_v25  ;;  %v1390_v36 = vpack.c.bf16 %v649_v0, %v649_v0  ;;  %v1384_v26 = vpack.c.bf16 %v634_v14, %v634_v14 }
 0x1a6   : > { %v721_v22 = vpack.c.bf16 %v483_v11, %v483_v11  ;;  %v1486_v11 = vunpack.c.l.b16 %v1390_v36 }
 0x1a8   : > { %v801_v23 = vunpack.c.l.b16 %v721_v22 }
 0x1a9   : > { %1016 = vmatpush.bf16.xpose.msra.mxu3 %v1001_v63  ;;  %v650_v58 = vpop.f32.mrf.mxu2  ;;  %v717_v63 = vpack.c.bf16 %v473_v17, %v473_v17 }
 0x1aa   : > { %v810_v27 = vpack.c.b16 %v801_v23, %v800_v6  ;;  %v651_v15 = vadd.f32 %v650_v58, %v2827_v54  ;;  %v636_v58 = vadd.f32 %v2773_v30, %v2827_v54  ;;  %v1480_v6 = vunpack.c.l.b16 %v1384_v26 }
 0x1ab   : > { %v797_v56 = vunpack.c.l.b16 %v717_v63  ;;  %v485_v21 = vpop.f32.mrf.mxu0 }
 0x1ac   : > { %v486_v49 = vadd.f32 %v485_v21, %v2750_v25  ;;  %v641_v21 = vadd.f32 %v2790_v62, %v2827_v54  ;;  %v1391_v12 = vpack.c.bf16 %v651_v15, %v651_v15 }
 0x1ad   : > { %v808_v35 = vpack.c.b16 %v797_v56, %v796_v10  ;;  %v644_v10 = vadd.f32 %v2800_v39, %v2827_v54  ;;  %v646_v56 = vadd.f32 %v2806_v24, %v2827_v54 }
 0x1ae   : > { %v722_v61 = vpack.c.bf16 %v486_v49, %v486_v49  ;;  %v1387_v62 = vpack.c.bf16 %v641_v21, %v641_v21  ;;  %v1487_v16 = vunpack.c.l.b16 %v1391_v12 }
 0x1af   : > { %v1388_v1 = vpack.c.bf16 %v644_v10, %v644_v10  ;;  %v1389_v30 = vpack.c.bf16 %v646_v56, %v646_v56 }
 0x1b0   : > { %886 = vmatmul.bf16.gmra.mxu3 %v806_v44 }
 0x1b1   : > { %1017 = vmatpush.bf16.xpose.msra.mxu3 %v1000_v37  ;;  %v653_v5 = vpop.f32.mrf.mxu2 }
 0x1b2   : > { %v654_v59 = vadd.f32 %v653_v5, %v2827_v54 }
 0x1b3   : > { %v487_v9 = vpop.f32.mrf.mxu0 }
 0x1b4   : > { %v488_v17 = vadd.f32 %v487_v9, %v2750_v25 }
 0x1b6   : > { %v723_v4 = vpack.c.bf16 %v488_v17, %v488_v17 }
 0x1b8   : > { %v803_v55 = vunpack.c.l.b16 %v723_v4 }
 0x1b9   : > { %1018 = vmatpush.bf16.xpose.msra.mxu3 %v999_v43  ;;  %v655_v48 = vpop.f32.mrf.mxu2 }
 0x1ba   : > { %v656_v32 = vadd.f32 %v655_v48, %v2827_v54 }
 0x1bb   : > { %v2829_v40 = vpop.f32.mrf.mxu0 }
 0x1bc   : > { %v1393_v51 = vpack.c.bf16 %v656_v32, %v656_v32  ;;  %v631_v32 = vadd.f32 %v2752_v34, %v2827_v54 }
 0x1c0   : > { %891 = vmatmul.bf16.gmra.mxu3 %v807_v2  ;;  %v1392_v2 = vpack.c.bf16 %v654_v59, %v654_v59  ;;  %v1483_v59 = vunpack.c.l.b16 %v1387_v62 }
 0x1c1   : > { %1019 = vmatpush.bf16.xpose.msra.mxu3 %v998_v41 }
 0x1c2   : > { %v1488_v24 = vunpack.c.l.b16 %v1392_v2  ;;  %v1383_v2 = vpack.c.bf16 %v631_v32, %v631_v32 }
 0x1c3   : > { %v492_v41 = vpop.f32.mrf.mxu0 }
 0x1c9   : > { %1020 = vmatpush.bf16.xpose.msra.mxu3 %v997_v20  ;;  %v658_v20 = vpop.f32.mrf.mxu2 }
 0x1ca   : > { %v659_v43 = vadd.f32 %v658_v20, %v2827_v54  ;;  %v1489_v20 = vunpack.c.l.b16 %v1393_v51  ;;  %v1479_v51 = vunpack.c.l.b16 %v1383_v2 }
 0x1cb   : > { %v495_v9 = vpop.f32.mrf.mxu0 }
 0x1cc   : > { %v1394_v18 = vpack.c.bf16 %v659_v43, %v659_v43  ;;  %v1499_v22 = vpack.c.b16 %v1489_v20, %v1488_v24  ;;  %v496_v56 = vadd.f32 %v495_v9, %v2750_v25 }
 0x1ce   : > { %v1490_v63 = vunpack.c.l.b16 %v1394_v18 }
 0x1d0   : > { %896 = vmatmul.bf16.gmra.mxu3 %v808_v35  ;;  %v639_v35 = vadd.f32 %v2786_v7, %v2827_v54  ;;  %v1385_v7 = vpack.c.bf16 %v636_v58, %v636_v58 }
 0x1d1   : > { %v660_v37 = vpop.f32.mrf.mxu2 }
 0x1d2   : > { %v661_v44 = vadd.f32 %v660_v37, %v2827_v54  ;;  %v802_v37 = vunpack.c.l.b16 %v722_v61 }
 0x1d3   : > { %v497_v0 = vpop.f32.mrf.mxu0 }
 0x1d4   : > { %v1395_v53 = vpack.c.bf16 %v661_v44, %v661_v44  ;;  %v811_v23 = vpack.c.b16 %v803_v55, %v802_v37  ;;  %v1481_v44 = vunpack.c.l.b16 %v1385_v7  ;;  %v498_v14 = vadd.f32 %v497_v0, %v2750_v25 }
 0x1d6   : > { %v1491_v5 = vunpack.c.l.b16 %v1395_v53  ;;  %v491_v53 = vadd.f32 %v2829_v40, %v2750_v25 }
 0x1d8   : > { %v1500_v42 = vpack.c.b16 %v1491_v5, %v1490_v63  ;;  %v724_v49 = vpack.c.bf16 %v491_v53, %v491_v53 }
 0x1d9   : > { %v663_v8 = vpop.f32.mrf.mxu2 }
 0x1da   : > { %v664_v13 = vadd.f32 %v663_v8, %v2827_v54  ;;  %v1484_v8 = vunpack.c.l.b16 %v1388_v1  ;;  %v933_v63 = vunpack.c.l.b16 %v724_v49  ;;  %v521_v49 = vadd.f32 %v2690_v52, %v2750_v25 }
 0x1dc   : > { %v1396_v50 = vpack.c.bf16 %v664_v13, %v664_v13  ;;  %v1485_v13 = vunpack.c.l.b16 %v1389_v30 }
 0x1de   : > { %v1492_v28 = vunpack.c.l.b16 %v1396_v50  ;;  %v1497_v18 = vpack.c.b16 %v1485_v13, %v1484_v8  ;;  %v516_v8 = vadd.f32 %v2674_v38, %v2750_v25  ;;  %v518_v13 = vadd.f32 %v2679_v47, %v2750_v25 }
 0x1e0   : > { %901 = vmatmul.bf16.gmra.mxu3 %v809_v19  ;;  %v1386_v19 = vpack.c.bf16 %v639_v35, %v639_v35  ;;  %v726_v35 = vpack.c.bf16 %v496_v56, %v496_v56 }
 0x1e1   : > { %v665_v31 = vpop.f32.mrf.mxu2 }
 0x1e2   : > { %v666_v57 = vadd.f32 %v665_v31, %v2827_v54  ;;  %v1482_v50 = vunpack.c.l.b16 %v1386_v19  ;;  %v629_v31 = vadd.f32 %v2737_v60, %v2827_v54  ;;  %v935_v61 = vunpack.c.l.b16 %v726_v35 }
 0x1e4   : > { %v1397_v3 = vpack.c.bf16 %v666_v57, %v666_v57  ;;  %v493_v57 = vadd.f32 %v492_v41, %v2750_v25  ;;  %v1382_v15 = vpack.c.bf16 %v629_v31, %v629_v31  ;;  %v500_v41 = vpop.f32.mrf.mxu0 }
 0x1e5   : > { %v501_v1 = vadd.f32 %v500_v41, %v2750_v25 }
 0x1e6   : > { %v1493_v46 = vunpack.c.l.b16 %v1397_v3  ;;  %v1495_v3 = vpack.c.b16 %v1481_v44, %v1480_v6  ;;  %v725_v17 = vpack.c.bf16 %v493_v57, %v493_v57  ;;  %v1478_v34 = vunpack.c.l.b16 %v1382_v15 }
 0x1e7   : > { %v728_v9 = vpack.c.bf16 %v501_v1, %v501_v1 }
 0x1e8   : > { %v1501_v48 = vpack.c.b16 %v1493_v46, %v1492_v28  ;;  %v1496_v28 = vpack.c.b16 %v1483_v59, %v1482_v50  ;;  %v934_v5 = vunpack.c.l.b16 %v725_v17  ;;  %v1494_v40 = vpack.c.b16 %v1479_v51, %v1478_v34 }
 0x1e9   : > { %v2853_v39 = vpop.f32.mrf.mxu2  ;;  %v937_v37 = vunpack.c.l.b16 %v728_v9  ;;  %v734_v59 = vpack.c.bf16 %v516_v8, %v516_v8  ;;  %v523_v17 = vadd.f32 %v2703_v29, %v2750_v25 }
 0x1ea   : > { %1510 = vmatpush.bf16.msrb.mxu0 %v1501_v48  ;;  %2005 = vmatpush.bf16.msra.mxu2 %v1501_v48  ;;  %v949_v46 = vpack.c.b16 %v934_v5, %v933_v63  ;;  %v727_v48 = vpack.c.bf16 %v498_v14, %v498_v14  ;;  %v736_v63 = vpack.c.bf16 %v521_v49, %v521_v49 }
 0x1eb   : > { %v943_v53 = vunpack.c.l.b16 %v734_v59  ;;  %v737_v5 = vpack.c.bf16 %v523_v17, %v523_v17 }
 0x1ec   : > { %v502_v36 = vpop.f32.mrf.mxu0  ;;  %v936_v4 = vunpack.c.l.b16 %v727_v48  ;;  %v945_v14 = vunpack.c.l.b16 %v736_v63 }
 0x1ed   : > { %v503_v30 = vadd.f32 %v502_v36, %v2750_v25  ;;  %v946_v35 = vunpack.c.l.b16 %v737_v5 }
 0x1ee   : > { %1511 = vmatpush.bf16.msrb.mxu0 %v1500_v42  ;;  %2006 = vmatpush.bf16.msra.mxu2 %v1500_v42  ;;  %v950_v24 = vpack.c.b16 %v936_v4, %v935_v61 }
 0x1ef   : > { %v729_v7 = vpack.c.bf16 %v503_v30, %v503_v30  ;;  %v955_v29 = vpack.c.b16 %v946_v35, %v945_v14 }
 0x1f0   : > { %906 = vmatmul.bf16.gmra.mxu3 %v810_v27  ;;  %v1498_v27 = vpack.c.b16 %v1487_v16, %v1486_v11 }
 0x1f1   : > { %v2855_v43 = vpop.f32.mrf.mxu2  ;;  %v938_v55 = vunpack.c.l.b16 %v729_v7 }
 0x1f2   : > { %1512 = vmatpush.bf16.msrb.mxu0 %v1499_v22  ;;  %2007 = vmatpush.bf16.msra.mxu2 %v1499_v22 }
 0x1f3   : > { %v951_v16 = vpack.c.b16 %v938_v55, %v937_v37 }
 0x1f4   : > { %v505_v42 = vpop.f32.mrf.mxu0 }
 0x1f5   : > { %v506_v6 = vadd.f32 %v505_v42, %v2750_v25  ;;  %v528_v42 = vadd.f32 %v2725_v45, %v2750_v25 }
 0x1f6   : > { %1513 = vmatpush.bf16.msrb.mxu0 %v1498_v27  ;;  %2008 = vmatpush.bf16.msra.mxu2 %v1498_v27  ;;  %v735_v27 = vpack.c.bf16 %v518_v13, %v518_v13 }
 0x1f7   : > { %v730_v31 = vpack.c.bf16 %v506_v6, %v506_v6  ;;  %v739_v30 = vpack.c.bf16 %v528_v42, %v528_v42 }
 0x1f8   : > { %v944_v38 = vunpack.c.l.b16 %v735_v27 }
 0x1f9   : > { %v2864_v60 = vpop.f32.mrf.mxu2  ;;  %v939_v57 = vunpack.c.l.b16 %v730_v31  ;;  %v948_v55 = vunpack.c.l.b16 %v739_v30 }
 0x1fa   : > { %1514 = vmatpush.bf16.msrb.mxu0 %v1497_v18  ;;  %2009 = vmatpush.bf16.msra.mxu2 %v1497_v18 }
 0x1fc   : > { %v507_v11 = vpop.f32.mrf.mxu0 }
 0x1fe   : > { %1515 = vmatpush.bf16.msrb.mxu0 %v1496_v28  ;;  %2010 = vmatpush.bf16.msra.mxu2 %v1496_v28  ;;  %v954_v28 = vpack.c.b16 %v944_v38, %v943_v53 }
 0x200   : > { %911 = vmatmul.bf16.gmra.mxu3 %v811_v23  ;;  %v508_v23 = vadd.f32 %v507_v11, %v2750_v25 }
 0x201   : > { %v2866_v10 = vpop.f32.mrf.mxu2 }
 0x202   : > { %1516 = vmatpush.bf16.msrb.mxu0 %v1495_v3  ;;  %2011 = vmatpush.bf16.msra.mxu2 %v1495_v3  ;;  %v731_v32 = vpack.c.bf16 %v508_v23, %v508_v23 }
 0x204   : > { %v510_v50 = vpop.f32.mrf.mxu0  ;;  %v940_v0 = vunpack.c.l.b16 %v731_v32 }
 0x205   : > { %v511_v34 = vadd.f32 %v510_v50, %v2750_v25 }
 0x206   : > { %1517 = vmatpush.bf16.msrb.mxu0 %v1494_v40  ;;  %2012 = vmatpush.bf16.msra.mxu2 %v1494_v40  ;;  %v952_v15 = vpack.c.b16 %v940_v0, %v939_v57 }
 0x207   : > { %v732_v41 = vpack.c.bf16 %v511_v34, %v511_v34 }
 0x209   : > { %v2873_v21 = vpop.f32.mrf.mxu2  ;;  %v941_v52 = vunpack.c.l.b16 %v732_v41 }
 0x20c   : > { %v512_v3 = vpop.f32.mrf.mxu0 }
 0x20d   : > { %v513_v51 = vadd.f32 %v512_v3, %v2750_v25 }
 0x210   : > { %1021 = vmatmul.bf16.vlgmr.msra.gmra.mxu3 %v949_v46  ;;  %v733_v46 = vpack.c.bf16 %v513_v51, %v513_v51 }
 0x211   : > { %v2878_v20 = vpop.f32.mrf.mxu2 }
 0x212   : > { %v942_v48 = vunpack.c.l.b16 %v733_v46 }
 0x213   : > { %v2870_v58 = vpop.f32.mrf.mxu3 }
 0x214   : > { %1062 = vmax.xlane.f32.xlu1 %v2870_v58  ;;  %v953_v61 = vpack.c.b16 %v942_v48, %v941_v52  ;;  %v679_v52 = vadd.f32 %v2873_v21, %v2827_v54  ;;  %v669_v21 = vadd.f32 %v2853_v39, %v2827_v54 }
 0x216   : > { %v1402_v42 = vpack.c.bf16 %v679_v52, %v679_v52 }
 0x219   : > { %v2884_v19 = vpop.f32.mrf.mxu2 }
 0x21b   : > { %v2875_v12 = vpop.f32.mrf.mxu3 }
 0x21c   : > { %1064 = vmax.xlane.f32.xlu1 %v2875_v12 }
 0x220   : > { %1026 = vmatmul.bf16.gmra.mxu3 %v950_v24  ;;  %v526_v24 = vadd.f32 %v2717_v33, %v2750_v25 }
 0x221   : > { %v2889_v22 = vpop.f32.mrf.mxu2 }
 0x222   : > { %v738_v1 = vpack.c.bf16 %v526_v24, %v526_v24  ;;  %v686_v48 = vadd.f32 %v2889_v22, %v2827_v54  ;;  %v676_v22 = vadd.f32 %v2866_v10, %v2827_v54 }
 0x223   : > { %v2882_v26 = vpop.f32.mrf.mxu3 }
 0x224   : > { %v947_v37 = vunpack.c.l.b16 %v738_v1 }
 0x229   : > { %v688_v18 = vpop.f32.mrf.mxu2 }
 0x22b   : > { %v2886_v62 = vpop.f32.mrf.mxu3 }
 0x22c   : > { %1068 = vmax.xlane.f32.xlu1 %v2886_v62 }
 0x230   : > { %1031 = vmatmul.bf16.gmra.mxu3 %v951_v16  ;;  %v956_v16 = vpack.c.b16 %v948_v55, %v947_v37  ;;  %v1627_v55 = vunpack.c.l.b16 %v1402_v42 }
 0x231   : > { %v690_v2 = vpop.f32.mrf.mxu2 }
 0x232   : > { %v691_v3 = vadd.f32 %v690_v2, %v2827_v54  ;;  %v684_v2 = vadd.f32 %v2884_v19, %v2827_v54  ;;  %v674_v19 = vadd.f32 %v2864_v60, %v2827_v54 }
 0x233   : > { %v2897_v44 = vpop.f32.mrf.mxu3 }
 0x234   : > { %1070 = vmax.xlane.f32.xlu1 %v2897_v44  ;;  %v1407_v46 = vpack.c.bf16 %v691_v3, %v691_v3  ;;  %v1404_v30 = vpack.c.bf16 %v684_v2, %v684_v2  ;;  %v1400_v39 = vpack.c.bf16 %v674_v19, %v674_v19 }
 0x239   : > { %v693_v56 = vpop.f32.mrf.mxu2 }
 0x23a   : > { %v694_v59 = vadd.f32 %v693_v56, %v2827_v54 }
 0x23b   : > { %v2900_v47 = vpop.f32.mrf.mxu3 }
 0x23c   : > { %1072 = vmax.xlane.f32.xlu2 %v2900_v47 }
 0x240   : > { %1036 = vmatmul.bf16.gmra.mxu3 %v952_v15  ;;  %v1408_v15 = vpack.c.bf16 %v694_v59, %v694_v59 }
 0x241   : > { %v695_v4 = vpop.f32.mrf.mxu2 }
 0x242   : > { %v696_v31 = vadd.f32 %v695_v4, %v2827_v54  ;;  %v1633_v56 = vunpack.c.l.b16 %v1408_v15 }
 0x243   : > { %v2909_v40 = vpop.f32.mrf.mxu3 }
 0x244   : > { %1074 = vmax.xlane.f32.xlu1 %v2909_v40  ;;  %v1409_v49 = vpack.c.bf16 %v696_v31, %v696_v31 }
 0x246   : > { %v1634_v14 = vunpack.c.l.b16 %v1409_v49 }
 0x248   : > { %v1644_v24 = vpack.c.b16 %v1634_v14, %v1633_v56 }
 0x249   : > { %v698_v7 = vpop.f32.mrf.mxu2 }
 0x24a   : > { %v699_v6 = vadd.f32 %v698_v7, %v2827_v54  ;;  %v1405_v7 = vpack.c.bf16 %v686_v48, %v686_v48 }
 0x24b   : > { %v2912_v36 = vpop.f32.mrf.mxu3 }
 0x24c   : > { %v1410_v32 = vpack.c.bf16 %v699_v6, %v699_v6  ;;  %v1398_v6 = vpack.c.bf16 %v669_v21, %v669_v21 }
 0x24e   : > { %v1635_v17 = vunpack.c.l.b16 %v1410_v32  ;;  %v1623_v60 = vunpack.c.l.b16 %v1398_v6 }
 0x250   : > { %1041 = vmatmul.bf16.gmra.mxu3 %v953_v61  ;;  %v1632_v61 = vunpack.c.l.b16 %v1407_v46 }
 0x251   : > { %v700_v8 = vpop.f32.mrf.mxu2 }
 0x252   : > { %v701_v23 = vadd.f32 %v700_v8, %v2827_v54 }
 0x253   : > { %v2918_v9 = vpop.f32.mrf.mxu3 }
 0x254   : > { %v1411_v53 = vpack.c.bf16 %v701_v23, %v701_v23 }
 0x256   : > { %v1636_v51 = vunpack.c.l.b16 %v1411_v53 }
 0x258   : > { %v1645_v35 = vpack.c.b16 %v1636_v51, %v1635_v17 }
 0x259   : > { %v703_v33 = vpop.f32.mrf.mxu2 }
 0x25a   : > { %v704_v45 = vadd.f32 %v703_v33, %v2827_v54  ;;  %v1629_v33 = vunpack.c.l.b16 %v1404_v30 }
 0x25b   : > { %v2920_v11 = vpop.f32.mrf.mxu3 }
 0x25c   : > { %1080 = vmax.xlane.f32.xlu1 %v2920_v11  ;;  %v1412_v50 = vpack.c.bf16 %v704_v45, %v704_v45  ;;  %v1630_v45 = vunpack.c.l.b16 %v1405_v7 }
 0x25e   : > { %v1637_v57 = vunpack.c.l.b16 %v1412_v50  ;;  %v1642_v59 = vpack.c.b16 %v1630_v45, %v1629_v33 }
 0x260   : > { %1046 = vmatmul.bf16.gmra.mxu3 %v954_v28  ;;  %v689_v28 = vadd.f32 %v688_v18, %v2827_v54  ;;  %v681_v18 = vadd.f32 %v2878_v20, %v2827_v54  ;;  %v671_v20 = vadd.f32 %v2855_v43, %v2827_v54  ;;  %v1401_v43 = vpack.c.bf16 %v676_v22, %v676_v22 }
 0x261   : > { %v705_v27 = vpop.f32.mrf.mxu2 }
 0x262   : > { %v706_v38 = vadd.f32 %v705_v27, %v2827_v54  ;;  %v1406_v41 = vpack.c.bf16 %v689_v28, %v689_v28  ;;  %v1403_v1 = vpack.c.bf16 %v681_v18, %v681_v18  ;;  %v1399_v23 = vpack.c.bf16 %v671_v20, %v671_v20 }
 0x263   : > { %v2923_v13 = vpop.f32.mrf.mxu3  ;;  %v1625_v54 = vunpack.c.l.b16 %v1400_v39  ;;  %v1626_v10 = vunpack.c.l.b16 %v1401_v43 }
 0x264   : > { %v1413_v0 = vpack.c.bf16 %v706_v38, %v706_v38  ;;  %v1628_v8 = vunpack.c.l.b16 %v1403_v1  ;;  %v1624_v31 = vunpack.c.l.b16 %v1399_v23 }
 0x265   : > { %v1640_v53 = vpack.c.b16 %v1626_v10, %v1625_v54 }
 0x266   : > { %v1638_v63 = vunpack.c.l.b16 %v1413_v0  ;;  %v1641_v27 = vpack.c.b16 %v1628_v8, %v1627_v55  ;;  %v1639_v38 = vpack.c.b16 %v1624_v31, %v1623_v60 }
 0x268   : > { %v1646_v5 = vpack.c.b16 %v1638_v63, %v1637_v57 }
 0x26a   : > { %1655 = vmatpush.bf16.msrb.mxu1 %v1646_v5 }
 0x26b   : > { %v2926_v25 = vpop.f32.mrf.mxu3 }
 0x26e   : > { %1656 = vmatpush.bf16.msrb.mxu1 %v1645_v35 }
 0x270   : > { %1051 = vmatmul.bf16.gmra.mxu3 %v955_v29  ;;  %v1631_v29 = vunpack.c.l.b16 %v1406_v41 }
 0x272   : > { %1657 = vmatpush.bf16.msrb.mxu1 %v1644_v24  ;;  %v1643_v37 = vpack.c.b16 %v1632_v61, %v1631_v29 }
 0x273   : > { %v2935_v34 = vpop.f32.mrf.mxu3 }
 0x276   : > { %1658 = vmatpush.bf16.msrb.mxu1 %v1643_v37 }
 0x27a   : > { %1659 = vmatpush.bf16.msrb.mxu1 %v1642_v59 }
 0x27b   : > { %v2945_v4 = vpop.f32.mrf.mxu3 }
 0x27e   : > { %1660 = vmatpush.bf16.msrb.mxu1 %v1641_v27 }
 0x280   : > { %1056 = vmatmul.bf16.gmra.mxu3 %v956_v16 }
 0x282   : > { %1661 = vmatpush.bf16.msrb.mxu1 %v1640_v53 }
 0x283   : > { %v2955_v50 = vpop.f32.mrf.mxu3 }
 0x286   : > { %1662 = vmatpush.bf16.msrb.mxu1 %v1639_v38 }
 0x287   : > { %v1063_v16 = vpop.xlane.xlu1 %1062 }
 0x28b   : > { %v2957_v32 = vpop.f32.mrf.mxu3 }
 0x28f   : > { %v1065_v0 = vpop.xlane.xlu1 %1064 }
 0x290   : > { %v1127_v3 = vsub.f32 %v2875_v12, %v1065_v0  ;;  %v1126_v12 = vsub.f32 %v2870_v58, %v1063_v16 }
 0x292   : > { %v1160_v15 = vmul.f32 1.442695, %v1127_v3  ;;  %v1158_v5 = vmul.f32 1.442695, %v1126_v12 }
 0x293   : > { %v1022_v57 = vpop.f32.mrf.mxu3 }
 0x294   : > { %1094 = vmax.xlane.f32.xlu0 %v1022_v57  ;;  %2086 = vpow2.f32 %v1160_v15 }
 0x295   : > { %2088 = vpow2.f32 %v1158_v5 }
 0x29a   : > { %v2961_v17 = vpop.eup %2086 }
 0x29b   : > { %v1024_v28 = vpop.f32.mrf.mxu3  ;;  %v2973_v46 = vpop.eup %2088 }
 0x29c   : > { %1096 = vmax.xlane.f32.xlu0 %v1024_v28 }
 0x29f   : > { %v1069_v2 = vpop.xlane.xlu1 %1068 }
 0x2a0   : > { %v1129_v61 = vsub.f32 %v2886_v62, %v1069_v2 }
 0x2a2   : > { %v1164_v24 = vmul.f32 1.442695, %v1129_v61 }
 0x2a3   : > { %v1027_v49 = vpop.f32.mrf.mxu3 }
 0x2a4   : > { %1066 = vmax.xlane.f32.xlu0 %v2882_v26  ;;  %1098 = vmax.xlane.f32.xlu2 %v1027_v49 }
 0x2a7   : > { %v1071_v43 = vpop.xlane.xlu1 %1070 }
 0x2a8   : > { %v1130_v27 = vsub.f32 %v2897_v44, %v1071_v43 }
 0x2aa   : > { %v1166_v10 = vmul.f32 1.442695, %v1130_v27 }
 0x2ab   : > { %v1029_v51 = vpop.f32.mrf.mxu3 }
 0x2ac   : > { %1224 = vadd.xlane.f32.xlu0 %v2961_v17  ;;  %1100 = vmax.xlane.f32.xlu2 %v1029_v51 }
 0x2af   : > { %v1073_v42 = vpop.xlane.xlu2 %1072 }
 0x2b0   : > { %v1131_v38 = vsub.f32 %v2900_v47, %v1073_v42 }
 0x2b2   : > { %v1168_v44 = vmul.f32 1.442695, %v1131_v38 }
 0x2b3   : > { %v2964_v63 = vpop.f32.mrf.mxu3 }
 0x2b4   : > { %1078 = vmax.xlane.f32.xlu0 %v2918_v9  ;;  %1076 = vmax.xlane.f32.xlu2 %v2912_v36 }
 0x2b7   : > { %v1075_v16 = vpop.xlane.xlu1 %1074 }
 0x2bb   : > { %v2969_v41 = vpop.f32.mrf.mxu3 }
 0x2bc   : > { %1102 = vmax.xlane.f32.xlu2 %v2964_v63  ;;  %1104 = vmax.xlane.f32.xlu0 %v2969_v41 }
 0x2c3   : > { %v2975_v56 = vpop.f32.mrf.mxu3 }
 0x2c4   : > { %1222 = vadd.xlane.f32.xlu2 %v2973_v46  ;;  %1106 = vmax.xlane.f32.xlu0 %v2975_v56 }
 0x2cb   : > { %v2979_v14 = vpop.f32.mrf.mxu3 }
 0x2cc   : > { %1108 = vmax.xlane.f32.xlu1 %v2979_v14 }
 0x2d3   : > { %v2982_v58 = vpop.f32.mrf.mxu3 }
 0x2d4   : > { %1110 = vmax.xlane.f32.xlu0 %v2982_v58 }
 0x2db   : > { %v2985_v35 = vpop.f32.mrf.mxu3 }
 0x2dc   : > { %1112 = vmax.xlane.f32.xlu1 %v2985_v35 }
 0x2e3   : > { %v2988_v52 = vpop.f32.mrf.mxu3 }
 0x2e4   : > { %1114 = vmax.xlane.f32.xlu2 %v2988_v52 }
 0x2eb   : > { %v3004_v59 = vpop.f32.mrf.mxu3 }
 0x307   : > { %v1095_v18 = vpop.xlane.xlu0 %1094 }
 0x308   : > { %v1142_v48 = vsub.f32 %v1022_v57, %v1095_v18 }
 0x30a   : > { %v1190_v29 = vmul.f32 1.442695, %v1142_v48 }
 0x30c   : > { %2090 = vpow2.f32 %v1190_v29 }
 0x30d   : > { %2092 = vpow2.f32 %v1164_v24 }
 0x30f   : > { %v1097_v1 = vpop.xlane.xlu0 %1096 }
 0x310   : > { %v1143_v30 = vsub.f32 %v1024_v28, %v1097_v1  ;;  %v3021_v28 = vpop.f32.mrf.mxu3 }
 0x312   : > { %v2992_v7 = vpop.eup %2090  ;;  %v1192_v21 = vmul.f32 1.442695, %v1143_v30 }
 0x313   : > { %1254 = vadd.xlane.f32.xlu2 %v2992_v7  ;;  %v2996_v37 = vpop.eup %2092 }
 0x314   : > { %2094 = vpow2.f32 %v1192_v21 }
 0x317   : > { %v1067_v20 = vpop.xlane.xlu0 %1066  ;;  %v1099_v19 = vpop.xlane.xlu2 %1098 }
 0x318   : > { %v1128_v22 = vsub.f32 %v2882_v26, %v1067_v20  ;;  %v1144_v8 = vsub.f32 %v1027_v49, %v1099_v19  ;;  %v3034_v29 = vpop.f32.mrf.mxu3 }
 0x31a   : > { %v2998_v55 = vpop.eup %2094  ;;  %v1162_v62 = vmul.f32 1.442695, %v1128_v22  ;;  %v1194_v33 = vmul.f32 1.442695, %v1144_v8 }
 0x31b   : > { %1256 = vadd.xlane.f32.xlu0 %v2998_v55  ;;  %1228 = vadd.xlane.f32.xlu2 %v2996_v37 }
 0x31c   : > { %2096 = vpow2.f32 %v1162_v62 }
 0x31d   : > { %2098 = vpow2.f32 %v1194_v33 }
 0x31f   : > { %v1225_v45 = vpop.xlane.xlu0 %1224  ;;  %v1101_v6 = vpop.xlane.xlu2 %1100 }
 0x320   : > { %v1145_v23 = vsub.f32 %v1029_v51, %v1101_v6  ;;  %v1081_v51 = vpop.xlane.xlu1 %1080  ;;  %v3050_v33 = vpop.f32.mrf.mxu3  ;;  %v1132_v6 = vsub.f32 %v2909_v40, %v1075_v16 }
 0x322   : > { %v3002_v39 = vpop.eup %2096  ;;  %v1196_v26 = vmul.f32 1.442695, %v1145_v23 }
 0x323   : > { %1226 = vadd.xlane.f32.xlu1 %v3002_v39  ;;  %1116 = vmax.xlane.f32.xlu0 %v3004_v59  ;;  %v3013_v54 = vpop.eup %2098 }
 0x324   : > { %2100 = vpow2.f32 %v1196_v26  ;;  %v1170_v26 = vmul.f32 1.442695, %v1132_v6 }
 0x325   : > { %2102 = vpow2.f32 %v1166_v10 }
 0x326   : > { %2104 = vrcp.f32 %v1225_v45 }
 0x327   : > { %v3009_v60 = vpop.xlane.xlu0 %1078  ;;  %v3011_v31 = vpop.xlane.xlu2 %1076  ;;  %2106 = vpow2.f32 %v1168_v44 }
 0x328   : > { %v1133_v23 = vsub.f32 %v2912_v36, %v3011_v31  ;;  %v3061_v44 = vpop.f32.mrf.mxu3  ;;  %v1134_v40 = vsub.f32 %v2918_v9, %v3009_v60 }
 0x32a   : > { %v3015_v53 = vpop.eup %2100  ;;  %v1172_v27 = vmul.f32 1.442695, %v1133_v23  ;;  %v1174_v31 = vmul.f32 1.442695, %v1134_v40 }
 0x32b   : > { %1258 = vadd.xlane.f32.xlu1 %v3013_v54  ;;  %1260 = vadd.xlane.f32.xlu2 %v3015_v53  ;;  %v3024_v49 = vpop.eup %2102 }
 0x32c   : > { %1084 = vmax.xlane.f32.xlu0 %v2926_v25  ;;  %v2105_v5 = vpop.eup %2104 }
 0x32d   : > { %v3030_v2 = vpop.eup %2106  ;;  %v1319_v61 = vmul.f32 %v2105_v5, %v2961_v17 }
 0x32f   : > { %v1103_v57 = vpop.xlane.xlu2 %1102  ;;  %v1105_v0 = vpop.xlane.xlu0 %1104  ;;  %v1351_v42 = vpack.c.bf16 %v1319_v61, %v1319_v61 }
 0x330   : > { %v1146_v3 = vsub.f32 %v2964_v63, %v1103_v57  ;;  %v1147_v47 = vsub.f32 %v2969_v41, %v1105_v0 }
 0x332   : > { %v1198_v15 = vmul.f32 1.442695, %v1146_v3  ;;  %v1200_v18 = vmul.f32 1.442695, %v1147_v47 }
 0x333   : > { %1082 = vmax.xlane.f32.xlu2 %v2923_v13  ;;  %1118 = vmax.xlane.f32.xlu1 %v3021_v28 }
 0x334   : > { %2108 = vpow2.f32 %v1198_v15  ;;  %1230 = vadd.xlane.f32.xlu0 %v3024_v49 }
 0x337   : > { %v1223_v12 = vpop.xlane.xlu2 %1222  ;;  %v1107_v63 = vpop.xlane.xlu0 %1106 }
 0x338   : > { %2110 = vrcp.f32 %v1223_v12  ;;  %v1148_v24 = vsub.f32 %v2975_v56, %v1107_v63  ;;  %v1431_v56 = vunpack.c.l.b16 %v1351_v42 }
 0x339   : > { %2112 = vpow2.f32 %v1200_v18 }
 0x33a   : > { %v3032_v48 = vpop.eup %2108  ;;  %v1202_v30 = vmul.f32 1.442695, %v1148_v24 }
 0x33b   : > { %1232 = vadd.xlane.f32.xlu1 %v3030_v2  ;;  %1120 = vmax.xlane.f32.xlu2 %v3034_v29 }
 0x33c   : > { %1262 = vadd.xlane.f32.xlu0 %v3032_v48  ;;  %2114 = vpow2.f32 %v1202_v30 }
 0x33e   : > { %v2111_v41 = vpop.eup %2110 }
 0x33f   : > { %v1318_v1 = vmul.f32 %v2111_v41, %v2973_v46  ;;  %v1109_v21 = vpop.xlane.xlu1 %1108  ;;  %v3043_v22 = vpop.eup %2112 }
 0x340   : > { %v1149_v20 = vsub.f32 %v2979_v14, %v1109_v21 }
 0x341   : > { %v1350_v19 = vpack.c.bf16 %v1318_v1, %v1318_v1 }
 0x342   : > { %v1204_v17 = vmul.f32 1.442695, %v1149_v20  ;;  %v3048_v46 = vpop.eup %2114 }
 0x343   : > { %v1430_v62 = vunpack.c.l.b16 %v1350_v19  ;;  %1264 = vadd.xlane.f32.xlu1 %v3043_v22  ;;  %1092 = vmax.xlane.f32.xlu2 %v2957_v32 }
 0x344   : > { %2116 = vpow2.f32 %v1204_v17  ;;  %1086 = vmax.xlane.f32.xlu0 %v2935_v34 }
 0x345   : > { %v1446_v8 = vpack.c.b16 %v1431_v56, %v1430_v62  ;;  %2118 = vpow2.f32 %v1170_v26 }
 0x346   : > { %2120 = vpow2.f32 %v1172_v27 }
 0x347   : > { %1518 = vmatmul.bf16.vlgmr.msrb.gmra.mxu0 %v1446_v8  ;;  %v1111_v45 = vpop.xlane.xlu0 %1110 }
 0x348   : > { %v1150_v43 = vsub.f32 %v2982_v58, %v1111_v45  ;;  %v1135_v58 = vsub.f32 %v2920_v11, %v1081_v51 }
 0x34a   : > { %v3052_v14 = vpop.eup %2116  ;;  %v1206_v10 = vmul.f32 1.442695, %v1150_v43  ;;  %v1176_v0 = vmul.f32 1.442695, %v1135_v58 }
 0x34b   : > { %1090 = vmax.xlane.f32.xlu1 %v2955_v50  ;;  %1266 = vadd.xlane.f32.xlu2 %v3048_v46  ;;  %v3070_v57 = vpop.eup %2118 }
 0x34c   : > { %1268 = vadd.xlane.f32.xlu0 %v3052_v14  ;;  %2122 = vpow2.f32 %v1206_v10  ;;  %v3072_v15 = vpop.eup %2120 }
 0x34d   : > { %2124 = vpow2.f32 %v1174_v31 }
 0x34f   : > { %v1113_v38 = vpop.xlane.xlu1 %1112 }
 0x350   : > { %v1151_v36 = vsub.f32 %v2985_v35, %v1113_v38 }
 0x352   : > { %v1208_v16 = vmul.f32 1.442695, %v1151_v36  ;;  %v3074_v9 = vpop.eup %2122 }
 0x353   : > { %1088 = vmax.xlane.f32.xlu1 %v2945_v4  ;;  %1122 = vmax.xlane.f32.xlu2 %v3050_v33  ;;  %v3080_v60 = vpop.eup %2124 }
 0x354   : > { %1124 = vmax.xlane.f32.xlu0 %v3061_v44  ;;  %2126 = vpow2.f32 %v1208_v16 }
 0x355   : > { %2128 = vpow2.f32 %v1176_v0 }
 0x357   : > { %v1115_v3 = vpop.xlane.xlu2 %1114 }
 0x358   : > { %v1152_v35 = vsub.f32 %v2988_v52, %v1115_v3 }
 0x35a   : > { %v1210_v11 = vmul.f32 1.442695, %v1152_v35  ;;  %v3082_v47 = vpop.eup %2126 }
 0x35b   : > { %1234 = vadd.xlane.f32.xlu1 %v3070_v57  ;;  %1236 = vadd.xlane.f32.xlu2 %v3072_v15  ;;  %v3084_v51 = vpop.eup %2128 }
 0x35c   : > { %1270 = vadd.xlane.f32.xlu0 %v3074_v9  ;;  %2130 = vpow2.f32 %v1210_v11 }
 0x362   : > { %v3089_v12 = vpop.eup %2130 }
 0x363   : > { %1272 = vadd.xlane.f32.xlu1 %v3082_v47  ;;  %1238 = vadd.xlane.f32.xlu2 %v3080_v60 }
 0x364   : > { %1240 = vadd.xlane.f32.xlu0 %v3084_v51 }
 0x36b   : > { %1274 = vadd.xlane.f32.xlu1 %v3089_v12 }
 0x386   : > { %v1255_v52 = vpop.xlane.xlu2 %1254 }
 0x387   : > { %2132 = vrcp.f32 %v1255_v52 }
 0x38d   : > { %v2133_v63 = vpop.eup %2132 }
 0x38e   : > { %v1257_v5 = vpop.xlane.xlu0 %1256  ;;  %v1229_v18 = vpop.xlane.xlu2 %1228  ;;  %v1334_v61 = vmul.f32 %v2133_v63, %v2992_v7 }
 0x38f   : > { %2134 = vrcp.f32 %v1257_v5 }
 0x390   : > { %2136 = vrcp.f32 %v1229_v18  ;;  %v1366_v41 = vpack.c.bf16 %v1334_v61, %v1334_v61 }
 0x392   : > { %v1575_v56 = vunpack.c.l.b16 %v1366_v41 }
 0x395   : > { %v2135_v24 = vpop.eup %2134 }
 0x396   : > { %v1335_v42 = vmul.f32 %v2135_v24, %v2998_v55  ;;  %v1227_v1 = vpop.xlane.xlu1 %1226  ;;  %v1117_v30 = vpop.xlane.xlu0 %1116 }
 0x397   : > { %v2137_v21 = vpop.eup %2136  ;;  %2138 = vrcp.f32 %v1227_v1  ;;  %v1153_v20 = vsub.f32 %v3004_v59, %v1117_v30 }
 0x398   : > { %v1367_v19 = vpack.c.bf16 %v1335_v42, %v1335_v42  ;;  %v1321_v8 = vmul.f32 %v2137_v21, %v2996_v37 }
 0x399   : > { %v1212_v17 = vmul.f32 1.442695, %v1153_v20 }
 0x39a   : > { %v1576_v62 = vunpack.c.l.b16 %v1367_v19  ;;  %v1353_v43 = vpack.c.bf16 %v1321_v8, %v1321_v8 }
 0x39b   : > { %2140 = vpow2.f32 %v1212_v17 }
 0x39c   : > { %v1591_v45 = vpack.c.b16 %v1576_v62, %v1575_v56  ;;  %v1433_v40 = vunpack.c.l.b16 %v1353_v43 }
 0x39d   : > { %v2139_v6 = vpop.eup %2138 }
 0x39e   : > { %v1259_v7 = vpop.xlane.xlu1 %1258  ;;  %1663 = vmatmul.bf16.vlgmr.msrb.gmra.mxu1 %v1591_v45  ;;  %v1261_v23 = vpop.xlane.xlu2 %1260  ;;  %v1320_v55 = vmul.f32 %v2139_v6, %v3002_v39 }
 0x39f   : > { %2142 = vrcp.f32 %v1259_v7  ;;  %v1085_v26 = vpop.xlane.xlu0 %1084 }
 0x3a0   : > { %2144 = vrcp.f32 %v1261_v23  ;;  %v1137_v59 = vsub.f32 %v2926_v25, %v1085_v26  ;;  %v1352_v27 = vpack.c.bf16 %v1320_v55, %v1320_v55 }
 0x3a1   : > { %v3098_v10 = vpop.eup %2140 }
 0x3a2   : > { %v1180_v38 = vmul.f32 1.442695, %v1137_v59  ;;  %1276 = vadd.xlane.f32.xlu2 %v3098_v10  ;;  %v1432_v37 = vunpack.c.l.b16 %v1352_v27 }
 0x3a4   : > { %2146 = vpow2.f32 %v1180_v38  ;;  %v1447_v36 = vpack.c.b16 %v1433_v40, %v1432_v37 }
 0x3a5   : > { %v2143_v58 = vpop.eup %2142 }
 0x3a6   : > { %v2145_v31 = vpop.eup %2144  ;;  %1523 = vmatmul.bf16.gmra.mxu0 %v1447_v36  ;;  %v1083_v39 = vpop.xlane.xlu2 %1082  ;;  %v1336_v0 = vmul.f32 %v2143_v58, %v3013_v54 }
 0x3a7   : > { %v1119_v16 = vpop.xlane.xlu1 %1118  ;;  %v1136_v3 = vsub.f32 %v2923_v13, %v1083_v39  ;;  %v1231_v25 = vpop.xlane.xlu0 %1230  ;;  %v1337_v11 = vmul.f32 %v2145_v31, %v3015_v53 }
 0x3a8   : > { %v1154_v35 = vsub.f32 %v3021_v28, %v1119_v16  ;;  %v1368_v52 = vpack.c.bf16 %v1336_v0, %v1336_v0  ;;  %2148 = vrcp.f32 %v1231_v25 }
 0x3a9   : > { %v1178_v5 = vmul.f32 1.442695, %v1136_v3  ;;  %v1369_v63 = vpack.c.bf16 %v1337_v11, %v1337_v11 }
 0x3aa   : > { %v1214_v18 = vmul.f32 1.442695, %v1154_v35  ;;  %v3105_v61 = vpop.eup %2146  ;;  %v1577_v24 = vunpack.c.l.b16 %v1368_v52 }
 0x3ab   : > { %2150 = vpow2.f32 %v1178_v5  ;;  %1244 = vadd.xlane.f32.xlu1 %v3105_v61  ;;  %v1578_v41 = vunpack.c.l.b16 %v1369_v63 }
 0x3ac   : > { %2152 = vpow2.f32 %v1214_v18 }
 0x3ad   : > { %v1592_v54 = vpack.c.b16 %v1578_v41, %v1577_v24 }
 0x3ae   : > { %v1121_v42 = vpop.xlane.xlu2 %1120  ;;  %v2149_v1 = vpop.eup %2148 }
 0x3af   : > { %v1233_v13 = vpop.xlane.xlu1 %1232  ;;  %1668 = vmatmul.bf16.gmra.mxu1 %v1592_v54  ;;  %v1263_v28 = vpop.xlane.xlu0 %1262  ;;  %v1155_v53 = vsub.f32 %v3034_v29, %v1121_v42  ;;  %v1322_v19 = vmul.f32 %v2149_v1, %v3024_v49 }
 0x3b0   : > { %2154 = vrcp.f32 %v1233_v13 }
 0x3b1   : > { %v3109_v30 = vpop.eup %2150  ;;  %2156 = vrcp.f32 %v1263_v28  ;;  %v1216_v21 = vmul.f32 1.442695, %v1155_v53  ;;  %v1354_v45 = vpack.c.bf16 %v1322_v19, %v1322_v19 }
 0x3b2   : > { %v3111_v20 = vpop.eup %2152  ;;  %1242 = vadd.xlane.f32.xlu0 %v3109_v30 }
 0x3b3   : > { %2158 = vpow2.f32 %v1216_v21  ;;  %1278 = vadd.xlane.f32.xlu2 %v3111_v20  ;;  %v1434_v59 = vunpack.c.l.b16 %v1354_v45 }
 0x3b6   : > { %v2155_v17 = vpop.eup %2154  ;;  %v1093_v62 = vpop.xlane.xlu2 %1092 }
 0x3b7   : > { %v1265_v56 = vpop.xlane.xlu1 %1264  ;;  %v1323_v8 = vmul.f32 %v2155_v17, %v3030_v2  ;;  %v2157_v29 = vpop.eup %2156  ;;  %v1141_v7 = vsub.f32 %v2957_v32, %v1093_v62 }
 0x3b8   : > { %v1087_v6 = vpop.xlane.xlu0 %1086  ;;  %2160 = vrcp.f32 %v1265_v56  ;;  %v1338_v38 = vmul.f32 %v2157_v29, %v3032_v48  ;;  %v2215_v56 = vld [vmem:[%s2538_s30 + $0x8] sm:$0xff] }
 0x3b9   : > { %v1138_v23 = vsub.f32 %v2935_v34, %v1087_v6  ;;  %v1355_v55 = vpack.c.bf16 %v1323_v8, %v1323_v8  ;;  %v3119_v43 = vpop.eup %2158  ;;  %v1188_v49 = vmul.f32 1.442695, %v1141_v7 }
 0x3ba   : > { %1280 = vadd.xlane.f32.xlu0 %v3119_v43  ;;  %v1370_v36 = vpack.c.bf16 %v1338_v38, %v1338_v38 }
 0x3bb   : > { %v1182_v26 = vmul.f32 1.442695, %v1138_v23  ;;  %v1435_v27 = vunpack.c.l.b16 %v1355_v55  ;;  %2162 = vpow2.f32 %v1188_v49 }
 0x3bc   : > { %v1579_v3 = vunpack.c.l.b16 %v1370_v36 }
 0x3bd   : > { %2164 = vpow2.f32 %v1182_v26  ;;  %v1448_v2 = vpack.c.b16 %v1435_v27, %v1434_v59 }
 0x3be   : > { %v2161_v37 = vpop.eup %2160  ;;  %v1267_v32 = vpop.xlane.xlu2 %1266 }
 0x3bf   : > { %1528 = vmatmul.bf16.gmra.mxu0 %v1448_v2  ;;  %v1091_v40 = vpop.xlane.xlu1 %1090  ;;  %v1339_v34 = vmul.f32 %v2161_v37, %v3043_v22  ;;  %2166 = vrcp.f32 %v1267_v32 }
 0x3c0   : > { %v1269_v58 = vpop.xlane.xlu0 %1268  ;;  %v1140_v31 = vsub.f32 %v2955_v50, %v1091_v40  ;;  %v2214_v50 = vld [vmem:[%s2538_s30] sm:$0xff] }
 0x3c1   : > { %2168 = vrcp.f32 %v1269_v58  ;;  %v1371_v39 = vpack.c.bf16 %v1339_v34, %v1339_v34  ;;  %v3125_v16 = vpop.eup %2162 }
 0x3c2   : > { %v1186_v48 = vmul.f32 1.442695, %v1140_v31  ;;  %1252 = vadd.xlane.f32.xlu2 %v3125_v16 }
 0x3c3   : > { %v3127_v0 = vpop.eup %2164  ;;  %v1580_v25 = vunpack.c.l.b16 %v1371_v39 }
 0x3c4   : > { %2170 = vpow2.f32 %v1186_v48  ;;  %1246 = vadd.xlane.f32.xlu0 %v3127_v0  ;;  %v1519_v22 = vpop.f32.mrf.mxu0 }
 0x3c5   : > { %v1593_v35 = vpack.c.b16 %v1580_v25, %v1579_v3  ;;  %v2167_v11 = vpop.eup %2166  ;;  %v1520_v52 = vadd.f32 %v2214_v50, %v1519_v22 }
 0x3c6   : > { %v1123_v63 = vpop.xlane.xlu2 %1122  ;;  %v1340_v42 = vmul.f32 %v2167_v11, %v3048_v46 }
 0x3c7   : > { %v2169_v5 = vpop.eup %2168  ;;  %1673 = vmatmul.bf16.gmra.mxu1 %v1593_v35  ;;  %v1089_v18 = vpop.xlane.xlu1 %1088  ;;  %1704 = vst [vmem:[%s3134_s18] sm:$0xff] %v1520_v52  ;;  %v1156_v41 = vsub.f32 %v3050_v33, %v1123_v63 }
 0x3c8   : > { %v1139_v24 = vsub.f32 %v2945_v4, %v1089_v18  ;;  %v1125_v54 = vpop.xlane.xlu0 %1124  ;;  %v1341_v1 = vmul.f32 %v2169_v5, %v3052_v14  ;;  %v1372_v33 = vpack.c.bf16 %v1340_v42, %v1340_v42  ;;  %v2216_v42 = vld [vmem:[%s2538_s30 + $0x80] sm:$0xff] }
 0x3c9   : > { %v1157_v13 = vsub.f32 %v3061_v44, %v1125_v54  ;;  %v1218_v21 = vmul.f32 1.442695, %v1156_v41 }
 0x3ca   : > { %v3142_v28 = vpop.eup %2170  ;;  %v1184_v53 = vmul.f32 1.442695, %v1139_v24  ;;  %v1373_v17 = vpack.c.bf16 %v1341_v1, %v1341_v1  ;;  %v1581_v8 = vunpack.c.l.b16 %v1372_v33 }
 0x3cb   : > { %v1220_v19 = vmul.f32 1.442695, %v1157_v13  ;;  %1250 = vadd.xlane.f32.xlu1 %v3142_v28 }
 0x3cc   : > { %2172 = vpow2.f32 %v1184_v53  ;;  %v1521_v4 = vpop.f32.mrf.mxu0  ;;  %v1582_v45 = vunpack.c.l.b16 %v1373_v17 }
 0x3cd   : > { %2174 = vpow2.f32 %v1218_v21  ;;  %v1522_v44 = vadd.f32 %v2215_v56, %v1521_v4 }
 0x3ce   : > { %2176 = vpow2.f32 %v1220_v19  ;;  %v1237_v46 = vpop.xlane.xlu2 %1236  ;;  %v1594_v23 = vpack.c.b16 %v1582_v45, %v1581_v8 }
 0x3cf   : > { %v1235_v62 = vpop.xlane.xlu1 %1234  ;;  %1705 = vst [vmem:[%s3134_s18 + $0x8] sm:$0xff] %v1522_v44 }
 0x3d0   : > { %2178 = vrcp.f32 %v1235_v62  ;;  %v1271_v14 = vpop.xlane.xlu0 %1270  ;;  %v2217_v62 = vld [vmem:[%s2538_s30 + $0x10] sm:$0xff] }
 0x3d1   : > { %2180 = vrcp.f32 %v1237_v46 }
 0x3d2   : > { %v3147_v29 = vpop.eup %2172  ;;  %2182 = vrcp.f32 %v1271_v14  ;;  %v2218_v14 = vld [vmem:[%s2538_s30 + $0x88] sm:$0xff] }
 0x3d3   : > { %v3149_v6 = vpop.eup %2174  ;;  %1248 = vadd.xlane.f32.xlu1 %v3147_v29 }
 0x3d4   : > { %v3152_v7 = vpop.eup %2176  ;;  %1282 = vadd.xlane.f32.xlu2 %v3149_v6 }
 0x3d5   : > { %1284 = vadd.xlane.f32.xlu0 %v3152_v7 }
 0x3d6   : > { %v2179_v55 = vpop.eup %2178  ;;  %v1239_v59 = vpop.xlane.xlu2 %1238 }
 0x3d7   : > { %v2181_v49 = vpop.eup %2180  ;;  %v1273_v26 = vpop.xlane.xlu1 %1272  ;;  %1678 = vmatmul.bf16.gmra.mxu1 %v1594_v23  ;;  %v1324_v27 = vmul.f32 %v2179_v55, %v3070_v57 }
 0x3d8   : > { %v2183_v38 = vpop.eup %2182  ;;  %2184 = vrcp.f32 %v1273_v26  ;;  %v1241_v2 = vpop.xlane.xlu0 %1240  ;;  %v1325_v37 = vmul.f32 %v2181_v49, %v3072_v15 }
 0x3d9   : > { %2186 = vrcp.f32 %v1239_v59  ;;  %v1356_v40 = vpack.c.bf16 %v1324_v27, %v1324_v27  ;;  %v1342_v36 = vmul.f32 %v2183_v38, %v3074_v9  ;;  %v2219_v59 = vld [vmem:[%s2538_s30 + $0x18] sm:$0xff] }
 0x3da   : > { %2188 = vrcp.f32 %v1241_v2  ;;  %v1357_v32 = vpack.c.bf16 %v1325_v37, %v1325_v37  ;;  %v2220_v2 = vld [vmem:[%s2538_s30 + $0x90] sm:$0xff] }
 0x3db   : > { %v1436_v34 = vunpack.c.l.b16 %v1356_v40  ;;  %v1374_v25 = vpack.c.bf16 %v1342_v36, %v1342_v36 }
 0x3dc   : > { %v1437_v58 = vunpack.c.l.b16 %v1357_v32 }
 0x3dd   : > { %v1583_v11 = vunpack.c.l.b16 %v1374_v25 }
 0x3de   : > { %v2185_v31 = vpop.eup %2184  ;;  %v1449_v39 = vpack.c.b16 %v1437_v58, %v1436_v34 }
 0x3df   : > { %v2187_v48 = vpop.eup %2186  ;;  %v1343_v3 = vmul.f32 %v2185_v31, %v3082_v47  ;;  %v1275_v47 = vpop.xlane.xlu1 %1274 }
 0x3e0   : > { %v2189_v57 = vpop.eup %2188  ;;  %1533 = vmatmul.bf16.gmra.mxu0 %v1449_v39  ;;  %v1326_v35 = vmul.f32 %v2187_v48, %v3080_v60  ;;  %2190 = vrcp.f32 %v1275_v47 }
 0x3e1   : > { %v1375_v22 = vpack.c.bf16 %v1343_v3, %v1343_v3  ;;  %v1327_v15 = vmul.f32 %v2189_v57, %v3084_v51  ;;  %v2221_v57 = vld [vmem:[%s2538_s30 + $0x98] sm:$0xff] }
 0x3e2   : > { %v1358_v5 = vpack.c.bf16 %v1326_v35, %v1326_v35 }
 0x3e3   : > { %v1584_v50 = vunpack.c.l.b16 %v1375_v22  ;;  %v1359_v9 = vpack.c.bf16 %v1327_v15, %v1327_v15 }
 0x3e4   : > { %v1438_v18 = vunpack.c.l.b16 %v1358_v5 }
 0x3e5   : > { %v1595_v52 = vpack.c.b16 %v1584_v50, %v1583_v11  ;;  %v1439_v63 = vunpack.c.l.b16 %v1359_v9  ;;  %v2222_v9 = vld [vmem:[%s2538_s30 + $0x20] sm:$0xff] }
 0x3e6   : > { %v2191_v54 = vpop.eup %2190 }
 0x3e7   : > { %1683 = vmatmul.bf16.gmra.mxu1 %v1595_v52  ;;  %v1450_v24 = vpack.c.b16 %v1439_v63, %v1438_v18  ;;  %v1344_v60 = vmul.f32 %v2191_v54, %v3089_v12 }
 0x3e9   : > { %v1376_v21 = vpack.c.bf16 %v1344_v60, %v1344_v60 }
 0x3eb   : > { %v1585_v33 = vunpack.c.l.b16 %v1376_v21 }
 0x3f0   : > { %1538 = vmatmul.bf16.gmra.mxu0 %v1450_v24 }
 0x415   : > { %v1277_v41 = vpop.xlane.xlu2 %1276 }
 0x416   : > { %2192 = vrcp.f32 %v1277_v41 }
 0x41b   : > { %v1664_v51 = vpop.f32.mrf.mxu1 }
 0x41c   : > { %v2193_v13 = vpop.eup %2192  ;;  %v1665_v1 = vadd.f32 %v2216_v42, %v1664_v51  ;;  %v2223_v51 = vld [vmem:[%s2538_s30 + $0x28] sm:$0xff]  ;;  %v2224_v42 = vld [vmem:[%s2538_s30 + $0xa0] sm:$0xff] }
 0x41d   : > { %v1345_v53 = vmul.f32 %v2193_v13, %v3098_v10 }
 0x41e   : > { %1720 = vst [vmem:[%s3134_s18 + $0x80] sm:$0xff] %v1665_v1  ;;  %v1245_v19 = vpop.xlane.xlu1 %1244 }
 0x41f   : > { %v1377_v4 = vpack.c.bf16 %v1345_v53, %v1345_v53  ;;  %2194 = vrcp.f32 %v1245_v19 }
 0x421   : > { %v1586_v17 = vunpack.c.l.b16 %v1377_v4 }
 0x423   : > { %v1524_v56 = vpop.f32.mrf.mxu0  ;;  %v1666_v44 = vpop.f32.mrf.mxu1  ;;  %v1596_v12 = vpack.c.b16 %v1586_v17, %v1585_v33 }
 0x424   : > { %v1525_v46 = vadd.f32 %v2217_v62, %v1524_v56  ;;  %v1667_v8 = vadd.f32 %v2218_v14, %v1666_v44 }
 0x425   : > { %1688 = vmatmul.bf16.gmra.mxu1 %v1596_v12  ;;  %v1243_v10 = vpop.xlane.xlu0 %1242  ;;  %v2195_v45 = vpop.eup %2194 }
 0x426   : > { %1706 = vst [vmem:[%s3134_s18 + $0x10] sm:$0xff] %v1525_v46  ;;  %v1279_v23 = vpop.xlane.xlu2 %1278  ;;  %2196 = vrcp.f32 %v1243_v10  ;;  %v1329_v55 = vmul.f32 %v2195_v45, %v3105_v61 }
 0x427   : > { %1721 = vst [vmem:[%s3134_s18 + $0x88] sm:$0xff] %v1667_v8  ;;  %2198 = vrcp.f32 %v1279_v23 }
 0x428   : > { %v1361_v34 = vpack.c.bf16 %v1329_v55, %v1329_v55 }
 0x42a   : > { %v1441_v61 = vunpack.c.l.b16 %v1361_v34  ;;  %v2226_v34 = vld [vmem:[%s2538_s30 + $0xb0] sm:$0xff] }
 0x42b   : > { %v1526_v49 = vpop.f32.mrf.mxu0 }
 0x42c   : > { %v2197_v26 = vpop.eup %2196  ;;  %v1527_v27 = vadd.f32 %v2219_v59, %v1526_v49  ;;  %v1669_v38 = vpop.f32.mrf.mxu1 }
 0x42d   : > { %v1670_v37 = vadd.f32 %v2220_v2, %v1669_v38  ;;  %v1281_v40 = vpop.xlane.xlu0 %1280  ;;  %v1328_v32 = vmul.f32 %v2197_v26, %v3109_v30  ;;  %v2199_v36 = vpop.eup %2198 }
 0x42e   : > { %1707 = vst [vmem:[%s3134_s18 + $0x18] sm:$0xff] %v1527_v27  ;;  %2200 = vrcp.f32 %v1281_v40  ;;  %v1346_v39 = vmul.f32 %v2199_v36, %v3111_v20 }
 0x42f   : > { %1722 = vst [vmem:[%s3134_s18 + $0x90] sm:$0xff] %v1670_v37  ;;  %v1360_v58 = vpack.c.bf16 %v1328_v32, %v1328_v32 }
 0x430   : > { %v1378_v15 = vpack.c.bf16 %v1346_v39, %v1346_v39  ;;  %v2228_v39 = vld [vmem:[%s2538_s30 + $0x30] sm:$0xff] }
 0x431   : > { %v1440_v31 = vunpack.c.l.b16 %v1360_v58 }
 0x432   : > { %v1587_v50 = vunpack.c.l.b16 %v1378_v15 }
 0x433   : > { %v1451_v48 = vpack.c.b16 %v1441_v61, %v1440_v31  ;;  %v2227_v31 = vld [vmem:[%s2538_s30 + $0xb8] sm:$0xff] }
 0x434   : > { %v2201_v3 = vpop.eup %2200  ;;  %v1671_v25 = vpop.f32.mrf.mxu1 }
 0x435   : > { %v1672_v22 = vadd.f32 %v2221_v57, %v1671_v25  ;;  %v1253_v35 = vpop.xlane.xlu2 %1252  ;;  %1543 = vmatmul.bf16.gmra.mxu0 %v1451_v48  ;;  %v1347_v30 = vmul.f32 %v2201_v3, %v3119_v43  ;;  %v2229_v57 = vld [vmem:[%s2538_s30 + $0xc0] sm:$0xff] }
 0x436   : > { %2202 = vrcp.f32 %v1253_v35  ;;  %v2230_v35 = vld [vmem:[%s2538_s30 + $0x38] sm:$0xff] }
 0x437   : > { %1723 = vst [vmem:[%s3134_s18 + $0x98] sm:$0xff] %v1672_v22  ;;  %v1379_v11 = vpack.c.bf16 %v1347_v30, %v1347_v30  ;;  %v1247_v63 = vpop.xlane.xlu0 %1246 }
 0x439   : > { %v1588_v52 = vunpack.c.l.b16 %v1379_v11 }
 0x43b   : > { %v1597_v20 = vpack.c.b16 %v1588_v52, %v1587_v50  ;;  %v2231_v50 = vld [vmem:[%s2538_s30 + $0xc8] sm:$0xff] }
 0x43c   : > { %v1529_v5 = vpop.f32.mrf.mxu0  ;;  %v2203_v47 = vpop.eup %2202 }
 0x43d   : > { %v1530_v18 = vadd.f32 %v2222_v9, %v1529_v5  ;;  %1693 = vmatmul.bf16.gmra.mxu1 %v1597_v20  ;;  %v1333_v43 = vmul.f32 %v2203_v47, %v3125_v16  ;;  %v2232_v5 = vld [vmem:[%s2538_s30 + $0x40] sm:$0xff]  ;;  %v2234_v47 = vld [vmem:[%s2538_s30 + $0xd0] sm:$0xff] }
 0x43e   : > { %v1251_v24 = vpop.xlane.xlu1 %1250 }
 0x43f   : > { %1708 = vst [vmem:[%s3134_s18 + $0x20] sm:$0xff] %v1530_v18  ;;  %2204 = vrcp.f32 %v1251_v24  ;;  %v1365_v53 = vpack.c.bf16 %v1333_v43, %v1333_v43  ;;  %v2233_v18 = vld [vmem:[%s2538_s30 + $0x48] sm:$0xff] }
 0x440   : > { %2206 = vrcp.f32 %v1247_v63 }
 0x441   : > { %v1445_v56 = vunpack.c.l.b16 %v1365_v53 }
 0x444   : > { %v1531_v41 = vpop.f32.mrf.mxu0  ;;  %v1674_v54 = vpop.f32.mrf.mxu1 }
 0x445   : > { %v2205_v60 = vpop.eup %2204  ;;  %v1532_v13 = vadd.f32 %v2223_v51, %v1531_v41  ;;  %v1675_v1 = vadd.f32 %v2224_v42, %v1674_v54  ;;  %v2235_v54 = vld [vmem:[%s2538_s30 + $0xd8] sm:$0xff] }
 0x446   : > { %v1332_v21 = vmul.f32 %v2205_v60, %v3142_v28  ;;  %v1249_v19 = vpop.xlane.xlu1 %1248  ;;  %v2207_v4 = vpop.eup %2206  ;;  %v2225_v28 = vld [vmem:[%s2538_s30 + $0xa8] sm:$0xff] }
 0x447   : > { %1709 = vst [vmem:[%s3134_s18 + $0x28] sm:$0xff] %v1532_v13  ;;  %2208 = vrcp.f32 %v1249_v19  ;;  %v1283_v33 = vpop.xlane.xlu2 %1282  ;;  %v1330_v12 = vmul.f32 %v2207_v4, %v3127_v0  ;;  %v2236_v13 = vld [vmem:[%s2538_s30 + $0x50] sm:$0xff]  ;;  %v2238_v4 = vld [vmem:[%s2538_s30 + $0xe0] sm:$0xff] }
 0x448   : > { %v1364_v17 = vpack.c.bf16 %v1332_v21, %v1332_v21  ;;  %1724 = vst [vmem:[%s3134_s18 + $0xa0] sm:$0xff] %v1675_v1  ;;  %2210 = vrcp.f32 %v1283_v33  ;;  %v1285_v16 = vpop.xlane.xlu0 %1284  ;;  %v2237_v21 = vld [vmem:[%s2538_s30 + $0x58] sm:$0xff] }
 0x449   : > { %2212 = vrcp.f32 %v1285_v16  ;;  %v1362_v23 = vpack.c.bf16 %v1330_v12, %v1330_v12  ;;  %v2239_v16 = vld [vmem:[%s2538_s30 + $0xe8] sm:$0xff]  ;;  %v2240_v12 = vld [vmem:[%s2538_s30 + $0x70] sm:$0xff] }
 0x44a   : > { %v1444_v44 = vunpack.c.l.b16 %v1364_v17 }
 0x44b   : > { %v1442_v27 = vunpack.c.l.b16 %v1362_v23 }
 0x44c   : > { %v1453_v62 = vpack.c.b16 %v1445_v56, %v1444_v44  ;;  %v1676_v46 = vpop.f32.mrf.mxu1 }
 0x44d   : > { %v2209_v14 = vpop.eup %2208  ;;  %v1677_v8 = vadd.f32 %v2225_v28, %v1676_v46 }
 0x44e   : > { %v2211_v10 = vpop.eup %2210  ;;  %v1331_v45 = vmul.f32 %v2209_v14, %v3147_v29  ;;  %1553 = vmatmul.bf16.vlgmr.msra.gmra.mxu2 %v1453_v62  ;;  %v2241_v14 = vld [vmem:[%s2538_s30 + $0x60] sm:$0xff] }
 0x44f   : > { %v2213_v55 = vpop.eup %2212  ;;  %v1348_v49 = vmul.f32 %v2211_v10, %v3149_v6  ;;  %1725 = vst [vmem:[%s3134_s18 + $0xa8] sm:$0xff] %v1677_v8  ;;  %v2242_v10 = vld [vmem:[%s2538_s30 + $0xf0] sm:$0xff] }
 0x450   : > { %v1349_v26 = vmul.f32 %v2213_v55, %v3152_v7  ;;  %v1363_v59 = vpack.c.bf16 %v1331_v45, %v1331_v45  ;;  %v2243_v55 = vld [vmem:[%s2538_s30 + $0x78] sm:$0xff] }
 0x451   : > { %v1380_v0 = vpack.c.bf16 %v1348_v49, %v1348_v49 }
 0x452   : > { %v1443_v38 = vunpack.c.l.b16 %v1363_v59  ;;  %v1381_v2 = vpack.c.bf16 %v1349_v26, %v1349_v26  ;;  %v2244_v59 = vld [vmem:[%s2538_s30 + $0x68] sm:$0xff] }
 0x453   : > { %v1589_v37 = vunpack.c.l.b16 %v1380_v0 }
 0x454   : > { %v1679_v29 = vpop.f32.mrf.mxu1  ;;  %v1452_v40 = vpack.c.b16 %v1443_v38, %v1442_v27  ;;  %v1590_v32 = vunpack.c.l.b16 %v1381_v2  ;;  %v2245_v38 = vld [vmem:[%s2538_s30 + $0xf8] sm:$0xff] }
 0x455   : > { %v1680_v6 = vadd.f32 %v2226_v34, %v1679_v29 }
 0x456   : > { %1548 = vmatmul.bf16.gmra.mxu0 %v1452_v40  ;;  %v1598_v36 = vpack.c.b16 %v1590_v32, %v1589_v37 }
 0x457   : > { %1726 = vst [vmem:[%s3134_s18 + $0xb0] sm:$0xff] %v1680_v6 }
 0x458   : > { %1698 = vmatmul.bf16.gmra.mxu1 %v1598_v36 }
 0x45c   : > { %v1681_v7 = vpop.f32.mrf.mxu1 }
 0x45d   : > { %v1534_v58 = vpop.f32.mrf.mxu0  ;;  %v1682_v61 = vadd.f32 %v2227_v31, %v1681_v7 }
 0x45e   : > { %v1535_v48 = vadd.f32 %v2228_v39, %v1534_v58 }
 0x45f   : > { %1727 = vst [vmem:[%s3134_s18 + $0xb8] sm:$0xff] %v1682_v61 }
 0x460   : > { %1710 = vst [vmem:[%s3134_s18 + $0x30] sm:$0xff] %v1535_v48 }
 0x464   : > { %v1684_v3 = vpop.f32.mrf.mxu1 }
 0x465   : > { %v1536_v25 = vpop.f32.mrf.mxu0  ;;  %v1685_v22 = vadd.f32 %v2229_v57, %v1684_v3 }
 0x466   : > { %v1537_v30 = vadd.f32 %v2230_v35, %v1536_v25 }
 0x467   : > { %1728 = vst [vmem:[%s3134_s18 + $0xc0] sm:$0xff] %v1685_v22 }
 0x468   : > { %1711 = vst [vmem:[%s3134_s18 + $0x38] sm:$0xff] %v1537_v30 }
 0x46c   : > { %v1686_v15 = vpop.f32.mrf.mxu1 }
 0x46d   : > { %v1539_v11 = vpop.f32.mrf.mxu0  ;;  %v1687_v52 = vadd.f32 %v2231_v50, %v1686_v15 }
 0x46e   : > { %v1540_v20 = vadd.f32 %v2232_v5, %v1539_v11 }
 0x46f   : > { %1729 = vst [vmem:[%s3134_s18 + $0xc8] sm:$0xff] %v1687_v52 }
 0x470   : > { %1712 = vst [vmem:[%s3134_s18 + $0x40] sm:$0xff] %v1540_v20 }
 0x475   : > { %v1541_v9 = vpop.f32.mrf.mxu0 }
 0x476   : > { %v1542_v63 = vadd.f32 %v2233_v18, %v1541_v9 }
 0x478   : > { %1713 = vst [vmem:[%s3134_s18 + $0x48] sm:$0xff] %v1542_v63 }
 0x4a2   : > { %v1689_v24 = vpop.f32.mrf.mxu1 }
 0x4a3   : > { %v1690_v43 = vadd.f32 %v2234_v47, %v1689_v24 }
 0x4a5   : > { %1730 = vst [vmem:[%s3134_s18 + $0xd0] sm:$0xff] %v1690_v43 }
 0x4aa   : > { %v1691_v41 = vpop.f32.mrf.mxu1 }
 0x4ab   : > { %v1692_v60 = vadd.f32 %v2235_v54, %v1691_v41 }
 0x4ad   : > { %1731 = vst [vmem:[%s3134_s18 + $0xd8] sm:$0xff] %v1692_v60 }
 0x4b2   : > { %v1544_v51 = vpop.f32.mrf.mxu0 }
 0x4b3   : > { %v1545_v42 = vadd.f32 %v2236_v13, %v1544_v51 }
 0x4b5   : > { %1714 = vst [vmem:[%s3134_s18 + $0x50] sm:$0xff] %v1545_v42 }
 0x4ba   : > { %v1546_v1 = vpop.f32.mrf.mxu0  ;;  %v1694_v53 = vpop.f32.mrf.mxu1 }
 0x4bb   : > { %v1547_v19 = vadd.f32 %v2237_v21, %v1546_v1  ;;  %v1695_v33 = vadd.f32 %v2238_v4, %v1694_v53 }
 0x4bd   : > { %1715 = vst [vmem:[%s3134_s18 + $0x58] sm:$0xff] %v1547_v19 }
 0x4be   : > { %1732 = vst [vmem:[%s3134_s18 + $0xe0] sm:$0xff] %v1695_v33 }
 0x4c2   : > { %v1696_v17 = vpop.f32.mrf.mxu1 }
 0x4c3   : > { %v1697_v56 = vadd.f32 %v2239_v16, %v1696_v17 }
 0x4c5   : > { %1733 = vst [vmem:[%s3134_s18 + $0xe8] sm:$0xff] %v1697_v56 }
 0x4d1   : > { %v1554_v44 = vpop.f32.mrf.mxu2 }
 0x4d2   : > { %v1555_v62 = vadd.f32 %v2240_v12, %v1554_v44 }
 0x4d3   : > { %v1549_v46 = vpop.f32.mrf.mxu0 }
 0x4d4   : > { %1718 = vst [vmem:[%s3134_s18 + $0x70] sm:$0xff] %v1555_v62  ;;  %v1550_v28 = vadd.f32 %v2241_v14, %v1549_v46 }
 0x4d5   : > { %v1699_v8 = vpop.f32.mrf.mxu1 }
 0x4d6   : > { %1716 = vst [vmem:[%s3134_s18 + $0x60] sm:$0xff] %v1550_v28  ;;  %v1700_v45 = vadd.f32 %v2242_v10, %v1699_v8 }
 0x4d8   : > { %1734 = vst [vmem:[%s3134_s18 + $0xf0] sm:$0xff] %v1700_v45 }
 0x4d9   : > { %v1556_v23 = vpop.f32.mrf.mxu2 }
 0x4da   : > { %v1557_v49 = vadd.f32 %v2243_v55, %v1556_v23 }
 0x4db   : > { %v1551_v26 = vpop.f32.mrf.mxu0 }
 0x4dc   : > { %1719 = vst [vmem:[%s3134_s18 + $0x78] sm:$0xff] %v1557_v49  ;;  %v1552_v0 = vadd.f32 %v2244_v59, %v1551_v26 }
 0x4dd   : > { %v1701_v27 = vpop.f32.mrf.mxu1 }
 0x4de   : > { %1717 = vst [vmem:[%s3134_s18 + $0x68] sm:$0xff] %v1552_v0  ;;  %v1702_v2 = vadd.f32 %v2245_v38, %v1701_v27 }
 0x4e0   : > { %1735 = vst [vmem:[%s3134_s18 + $0xf8] sm:$0xff] %v1702_v2 }
 0x4e1   : > { %2363 = shalt.err (!%p2360_p10)
}
 0x4e2   : > { %s2414_s22 = smov 128   ;;  %s2415_s24 = smov 8  }
 0x4e3   : > { %2023 = dma.vmem_to_hbm [thread:$0]  (%p2502_p3), %s1751_s29, 4096, %s1753_s4, %s1737_s16, %s2414_s22, %s2414_s22, %s2415_s24  }
 0x4e4 PF: > { %s1767_s25 = sand.u32 1, %s2394_s12   ;;  %p3277_p12 = scmp.ge.s32.totalorder %s2406_s15, 2 }
 0x4e5   : > { %s1768_s30 = scalar_lea.sflag [#allocation4], %s1767_s25 }
 0x4e6   : > { %p2037_p13 = pnand %p3277_p12, %p2471_p6 }
 0x4e8   : > { %p2038_p0 = pneg %p2037_p13 }
 0x4ea   : > { %2389 = dma.done.wait (%p2038_p0), %s1768_s30, 4096  }
 0x4eb   : > { %2391 = vsyncadd (%p2038_p0), %s1768_s30, 4294963200  ;;  %p17_p5 = scmp.ge.s32.totalorder %s2492_s6, 4   ;;  %s3278_s12 = smov %s2398_s13 }
 0x4ec   : > { %s3279_s13 = smov %s2402_s14  ;;  %s3280_s14 = smov %s2508_s10 }
 0x4ed   : > { %s3281_s15 = smov %s2492_s6  ;;  %19 = sbr.rel (!%p17_p5) target bundleno = 6 (0x6), region = 85 }
 0x4f2   :  { %1774 = vsyncpa [#allocation3], 1 }
 0x4f3   :  { %1776 = vsyncpa [#allocation3 + $0x1], 1 }
 0x4f4   :  { %1777 = vsyncpa [#allocation6], 1 }
 0x4f5   :  { %1778 = vsyncpa [#allocation4], 1 }
 0x4f6   :  { %1780 = vsyncpa [#allocation4 + $0x1], 1 }

</bundles_post_ra>
